<compile_context>
chip_gen: v6e
topology: v6e:2x2x1
jax: 0.10.0
libtpu: 0.0.40
codegen_flags: <defaults>
</compile_context>

<pallas_src>
import math
import functools

import jax
import jax.numpy as jnp
from jax.experimental import pallas as pl
from jax.experimental.pallas import tpu as pltpu

LN_EPS = 1e-5
BN_EPS = 1e-5
NEG_INF = -1e9


# ----------------------------------------------------------------------------
# Fused kernel: one grid step == one encoder layer
# ----------------------------------------------------------------------------
def _fused_kernel(B, S, D, H,
                  lengths_ref,                                     # (B,1,1) i32
                  xa_ref, wa_ref, ba_ref,                          # embedding
                  lin_w_ref, lin_b_ref, ln_in_g_ref, ln_in_b_ref, pe_ref,
                  wq_ref, bq_ref, wk_ref, bk_ref, wv_ref, bv_ref,  # per-layer
                  wo_ref, bo_ref, ln1_g_ref, ln1_b_ref,
                  w1_ref, b1_ref, w2_ref, b2_ref, ln2_g_ref, ln2_b_ref,
                  cw1_ref, cb1_ref, bng_ref, bnb_ref, bnm_ref, bnv_ref,
                  cw2_ref, cb2_ref,
                  o_ref,
                  enc_ref):                                        # VMEM scratch
    l = pl.program_id(0)
    n_layers = pl.num_programs(0)
    BS = B * S
    dk = D // H
    scale = 1.0 / math.sqrt(dk)
    f32, bf16 = jnp.float32, jnp.bfloat16

    # ---- pad masks: one vectorized iota pass from lengths -------------------
    lens = lengths_ref[...]                                          # (B,1,1)
    key_iota = jax.lax.broadcasted_iota(jnp.int32, (1, 1, S), 2)
    row_iota = jax.lax.broadcasted_iota(jnp.int32, (1, S, 1), 1)
    bias = jnp.where(key_iota < lens, 0.0, NEG_INF).astype(f32)      # (B,1,S)
    npm = (row_iota < lens).astype(f32).reshape(BS, 1)               # (BS,1)

    def layer_norm(y, g, b):
        mu = jnp.mean(y, axis=-1, keepdims=True)
        var = jnp.mean(jnp.square(y - mu), axis=-1, keepdims=True)
        return (y - mu) * jax.lax.rsqrt(var + LN_EPS) * g + b

    # ---- embedding: fused (init_fc | CLS), linear_in, LN, +PE  (l == 0) -----
    @pl.when(l == 0)
    def _():
        xcat = jnp.dot(xa_ref[...], wa_ref[...],
                       preferred_element_type=f32) + ba_ref[...]
        y = jnp.dot(xcat.astype(bf16), lin_w_ref[...],
                    preferred_element_type=f32) + lin_b_ref[...]
        y = layer_norm(y, ln_in_g_ref[...], ln_in_b_ref[...])
        y = (y.reshape(B, S, D) + pe_ref[...]).reshape(BS, D)        # +PE
        enc_ref[...] = y

    # ---- one encoder layer ---------------------------------------------------
    enc = enc_ref[...]                                               # (BS,D) f32
    enc_b = enc.astype(bf16)
    q = jnp.dot(enc_b, wq_ref[...], preferred_element_type=f32) + bq_ref[...]
    k = jnp.dot(enc_b, wk_ref[...], preferred_element_type=f32) + bk_ref[...]
    v = jnp.dot(enc_b, wv_ref[...], preferred_element_type=f32) + bv_ref[...]
    q3 = q.reshape(B, S, D).astype(bf16)
    k3 = k.reshape(B, S, D).astype(bf16)
    v3 = v.reshape(B, S, D).astype(bf16)

    heads = []
    for h in range(H):                                               # H static
        lo = h * dk
        qh = q3[:, :, lo:lo + dk]
        kh = k3[:, :, lo:lo + dk]
        vh = v3[:, :, lo:lo + dk]
        s = jnp.einsum('bqd,bkd->bqk', qh, kh,
                       preferred_element_type=f32) * scale + bias    # (B,S,S)
        s = s - jnp.max(s, axis=-1, keepdims=True)
        p = jnp.exp(s)
        # softmax denominator on the EUP; approx=True is a documented deviation
        p = p * pl.reciprocal(jnp.sum(p, axis=-1, keepdims=True), approx=True)
        heads.append(jnp.einsum('bqk,bkd->bqd', p.astype(bf16), vh,
                                preferred_element_type=f32))         # (B,S,dk)
    ctx = jnp.concatenate(heads, axis=-1).reshape(BS, D)

    attn = jnp.dot(ctx.astype(bf16), wo_ref[...],
                   preferred_element_type=f32) + bo_ref[...]
    y1 = layer_norm(attn + enc, ln1_g_ref[...], ln1_b_ref[...]) * npm

    ff = jnp.dot(y1.astype(bf16), w1_ref[...],
                 preferred_element_type=f32) + b1_ref[...]
    ff = jnp.maximum(ff, 0.0)
    ff = jnp.dot(ff.astype(bf16), w2_ref[...],
                 preferred_element_type=f32) + b2_ref[...]
    enc_new = layer_norm(ff + y1, ln2_g_ref[...], ln2_b_ref[...]) * npm
    enc_ref[...] = enc_new

    # ---- classifier on CLS rows only  (l == L-1) -----------------------------
    @pl.when(l == n_layers - 1)
    def _():
        # one-hot CLS row selection on the MXU: CLS of batch b is flat row b*S
        row = jax.lax.broadcasted_iota(jnp.int32, (B, BS), 0)
        col = jax.lax.broadcasted_iota(jnp.int32, (B, BS), 1)
        sel = (col == row * S).astype(f32)                           # (B,BS)
        cls = jax.lax.dot_general(sel, enc_new, (((1,), (0,)), ((), ())),
                                  preferred_element_type=f32)        # (B,D)
        hc = jnp.dot(cls.astype(bf16), cw1_ref[...],
                     preferred_element_type=f32) + cb1_ref[...]
        hc = (hc - bnm_ref[...]) * jax.lax.rsqrt(bnv_ref[...] + BN_EPS)
        hc = hc * bng_ref[...] + bnb_ref[...]
        hc = jnp.maximum(hc, 0.0)
        logit = jnp.dot(hc.astype(bf16), cw2_ref[...],
                        preferred_element_type=f32) + cb2_ref[...]
        o_ref[...] = 1.0 / (1.0 + jnp.exp(-logit))


# ----------------------------------------------------------------------------
# Full forward pass (mirrors BINARY_T_TRANSFORMER.forward)
# ----------------------------------------------------------------------------
def binary_t_transformer_forward(params, x, h, m, d, x_m, input_lengths, n_head):
    # h, m, d, x_m are accepted but unused, exactly like the PyTorch forward.
    del h, m, d, x_m
    B, T, F = x.shape
    D = params["init_fc_w"].shape[1]
    DFF = params["w1"].shape[2]
    L = params["wq"].shape[0]
    T1 = T + 1                                  # CLS token prepended
    S = ((T1 + 7) // 8) * 8                     # pad seq length to sublane tile
    BS = B * S
    f32, bf16 = jnp.float32, jnp.bfloat16

    lengths = (input_lengths.astype(jnp.int32) + 1).reshape(B, 1, 1)

    # Augmented input: [features | CLS indicator].  Row b*S is the CLS slot,
    # rows b*S+1..b*S+T carry x[b]; remaining rows are padding (masked keys).
    feat = jnp.concatenate([jnp.zeros((B, 1, F), f32), x.astype(f32),
                            jnp.zeros((B, S - T1, F), f32)], axis=1)
    ind = jnp.zeros((B, S, 1), f32).at[:, 0, 0].set(1.0)
    xa = jnp.concatenate([feat, ind], axis=-1).reshape(BS, F + 1).astype(bf16)
    wa = jnp.concatenate([params["init_fc_w"],
                          params["cls_token"] - params["init_fc_b"]],
                         axis=0).astype(bf16)
    pe = jnp.concatenate([params["pe"][:T1], jnp.zeros((S - T1, D), f32)],
                         axis=0)                 # (S, D), broadcast in-kernel

    kernel = functools.partial(_fused_kernel, B, S, D, n_head)

    const = lambda shape: pl.BlockSpec(shape, lambda l: (0,) * len(shape))
    layer = lambda shape: pl.BlockSpec((None,) + shape,
                                       lambda l: (l,) + (0,) * len(shape))

    grid_spec = pltpu.PrefetchScalarGridSpec(
        num_scalar_prefetch=0,
        grid=(L,),
        in_specs=[
            const((B, 1, 1)),                    # lengths
            const((BS, F + 1)),                  # xa
            const((F + 1, D)),                   # wa
            const((1, D)),                       # init_fc bias
            const((D, D)), const((1, D)),        # linear_in w/b
            const((1, D)), const((1, D)),        # ln_in g/b
            const((S, D)),                       # pe
            layer((D, D)), layer((1, D)),        # wq, bq
            layer((D, D)), layer((1, D)),        # wk, bk
            layer((D, D)), layer((1, D)),        # wv, bv
            layer((D, D)), layer((1, D)),        # wo, bo
            layer((1, D)), layer((1, D)),        # ln1 g/b
            layer((D, DFF)), layer((1, DFF)),    # w1, b1
            layer((DFF, D)), layer((1, D)),      # w2, b2
            layer((1, D)), layer((1, D)),        # ln2 g/b
            const((D, 64)), const((1, 64)),      # cls_w1, cls_b1
            const((1, 64)), const((1, 64)),      # bn gamma/beta
            const((1, 64)), const((1, 64)),      # bn mean/var
            const((64, 1)), const((1, 1)),       # cls_w2, cls_b2
        ],
        out_specs=pl.BlockSpec((B, 1), lambda l: (0, 0)),
        scratch_shapes=[pltpu.VMEM((BS, D), jnp.float32)],   # activations carry
    )

    probs = pl.pallas_call(
        kernel,
        out_shape=jax.ShapeDtypeStruct((B, 1), jnp.float32),
        grid_spec=grid_spec,
        compiler_params=pltpu.CompilerParams(
            dimension_semantics=("arbitrary",),
            vmem_limit_bytes=32 * 1024 * 1024),
    )(lengths, xa, wa, params["init_fc_b"],
      params["lin_in_w"].astype(bf16), params["lin_in_b"],
      params["ln_in_g"], params["ln_in_b"], pe,
      params["wq"].astype(bf16), params["bq"],
      params["wk"].astype(bf16), params["bk"],
      params["wv"].astype(bf16), params["bv"],
      params["wo"].astype(bf16), params["bo"],
      params["ln1_g"], params["ln1_b"],
      params["w1"].astype(bf16), params["b1"],
      params["w2"].astype(bf16), params["b2"],
      params["ln2_g"], params["ln2_b"],
      params["cls_w1"].astype(bf16), params["cls_b1"],
      params["bn_g"], params["bn_b"], params["bn_mean"], params["bn_var"],
      params["cls_w2"].astype(bf16), params["cls_b2"])

    return probs                                 # (B, 1) sigmoid probabilities


# ----------------------------------------------------------------------------
# Parameters (deterministic, synthetic)
# ----------------------------------------------------------------------------
def sinusoid_pe(max_len, d_model):
    position = jnp.arange(max_len, dtype=jnp.float32)[:, None]
    div = jnp.exp(jnp.arange(0, d_model, 2, dtype=jnp.float32)
                  * (-math.log(10000.0) / d_model))
    pe = jnp.zeros((max_len, d_model), jnp.float32)
    pe = pe.at[:, 0::2].set(jnp.sin(position * div))
    pe = pe.at[:, 1::2].set(jnp.cos(position * div))
    return pe


def init_params(key, num_nodes, D, L, DFF, pe_maxlen=200):
    ks = iter(jax.random.split(key, 64))

    def dense(fan_in, shape):
        return jax.random.normal(next(ks), shape, jnp.float32) / math.sqrt(fan_in)

    p = {}
    p["init_fc_w"] = dense(num_nodes, (num_nodes, D))
    p["init_fc_b"] = jnp.zeros((1, D), jnp.float32)
    p["cls_token"] = 0.02 * jax.random.normal(next(ks), (1, D), jnp.float32)
    p["lin_in_w"] = dense(D, (D, D))
    p["lin_in_b"] = jnp.zeros((1, D), jnp.float32)
    p["ln_in_g"] = jnp.ones((1, D), jnp.float32)
    p["ln_in_b"] = jnp.zeros((1, D), jnp.float32)
    p["pe"] = sinusoid_pe(pe_maxlen, D)

    def stack(fan_in, shape):
        return jnp.stack([dense(fan_in, shape) for _ in range(L)])

    p["wq"] = stack(D, (D, D)); p["bq"] = jnp.zeros((L, 1, D), jnp.float32)
    p["wk"] = stack(D, (D, D)); p["bk"] = jnp.zeros((L, 1, D), jnp.float32)
    p["wv"] = stack(D, (D, D)); p["bv"] = jnp.zeros((L, 1, D), jnp.float32)
    p["wo"] = stack(D, (D, D)); p["bo"] = jnp.zeros((L, 1, D), jnp.float32)
    p["ln1_g"] = jnp.ones((L, 1, D), jnp.float32)
    p["ln1_b"] = jnp.zeros((L, 1, D), jnp.float32)
    p["w1"] = stack(D, (D, DFF)); p["b1"] = jnp.zeros((L, 1, DFF), jnp.float32)
    p["w2"] = stack(DFF, (DFF, D)); p["b2"] = jnp.zeros((L, 1, D), jnp.float32)
    p["ln2_g"] = jnp.ones((L, 1, D), jnp.float32)
    p["ln2_b"] = jnp.zeros((L, 1, D), jnp.float32)

    p["cls_w1"] = dense(D, (D, 64))
    p["cls_b1"] = jnp.zeros((1, 64), jnp.float32)
    p["bn_g"] = jnp.ones((1, 64), jnp.float32)
    p["bn_b"] = jnp.zeros((1, 64), jnp.float32)
    p["bn_mean"] = jnp.zeros((1, 64), jnp.float32)
    p["bn_var"] = jnp.ones((1, 64), jnp.float32)
    p["cls_w2"] = dense(64, (64, 1))
    p["cls_b2"] = jnp.zeros((1, 1), jnp.float32)
    return p


# ----------------------------------------------------------------------------
# Demo
# ----------------------------------------------------------------------------
if __name__ == "__main__":
    # args: vitalsign_labtest -> 16 features, window_size=8,
    #       transformer_num_layers=2, transformer_num_head=4, transformer_dim=32
    B, T, F, D, H, L = 2, 8, 16, 32, 4, 2
    DFF = D * 4

    key = jax.random.PRNGKey(0)
    kx, kp = jax.random.split(key)

    x = jax.random.normal(kx, (B, T, F), jnp.float32)
    h = jnp.zeros((B, D), jnp.float32)        # unused by forward
    m = jnp.zeros((B, T, F), jnp.float32)     # unused by forward
    dd = jnp.zeros((B, T, F), jnp.float32)    # unused by forward
    x_m = jnp.zeros((B, T, F), jnp.float32)   # unused by forward
    input_lengths = jnp.array([8, 5], jnp.int32)

    params = init_params(kp, F, D, L, DFF)

    # TODO(synk): exact internals of the referenced TransformerEncoder are not in
    # the prompt; a standard Speech-Transformer post-LN encoder with CLS token,
    # sinusoidal PE and length-based pad masking is implemented here.
    out = binary_t_transformer_forward(params, x, h, m, dd, x_m, input_lengths, H)
    out = jax.block_until_ready(out)

    assert out.shape == (B, 1)
    assert bool(jnp.all(jnp.isfinite(out)))
    assert bool(jnp.all((out >= 0.0) & (out <= 1.0)))
    print("KERNEL_OK")
</pallas_src>

<mosaic_0001>
module attributes {stable_mosaic.version = 11 : i64} {
  func.func @_fused_kernel(%arg0: i32, %arg1: memref<2x1x1xi32, #tpu.memory_space<vmem>>, %arg2: memref<32x17xbf16, #tpu.memory_space<vmem>>, %arg3: memref<17x32xbf16, #tpu.memory_space<vmem>>, %arg4: memref<1x32xf32, #tpu.memory_space<vmem>>, %arg5: memref<32x32xbf16, #tpu.memory_space<vmem>>, %arg6: memref<1x32xf32, #tpu.memory_space<vmem>>, %arg7: memref<1x32xf32, #tpu.memory_space<vmem>>, %arg8: memref<1x32xf32, #tpu.memory_space<vmem>>, %arg9: memref<16x32xf32, #tpu.memory_space<vmem>>, %arg10: memref<1x32x32xbf16, #tpu.memory_space<vmem>>, %arg11: memref<1x1x32xf32, #tpu.memory_space<vmem>>, %arg12: memref<1x32x32xbf16, #tpu.memory_space<vmem>>, %arg13: memref<1x1x32xf32, #tpu.memory_space<vmem>>, %arg14: memref<1x32x32xbf16, #tpu.memory_space<vmem>>, %arg15: memref<1x1x32xf32, #tpu.memory_space<vmem>>, %arg16: memref<1x32x32xbf16, #tpu.memory_space<vmem>>, %arg17: memref<1x1x32xf32, #tpu.memory_space<vmem>>, %arg18: memref<1x1x32xf32, #tpu.memory_space<vmem>>, %arg19: memref<1x1x32xf32, #tpu.memory_space<vmem>>, %arg20: memref<1x32x128xbf16, #tpu.memory_space<vmem>>, %arg21: memref<1x1x128xf32, #tpu.memory_space<vmem>>, %arg22: memref<1x128x32xbf16, #tpu.memory_space<vmem>>, %arg23: memref<1x1x32xf32, #tpu.memory_space<vmem>>, %arg24: memref<1x1x32xf32, #tpu.memory_space<vmem>>, %arg25: memref<1x1x32xf32, #tpu.memory_space<vmem>>, %arg26: memref<32x64xbf16, #tpu.memory_space<vmem>>, %arg27: memref<1x64xf32, #tpu.memory_space<vmem>>, %arg28: memref<1x64xf32, #tpu.memory_space<vmem>>, %arg29: memref<1x64xf32, #tpu.memory_space<vmem>>, %arg30: memref<1x64xf32, #tpu.memory_space<vmem>>, %arg31: memref<1x64xf32, #tpu.memory_space<vmem>>, %arg32: memref<64x1xbf16, #tpu.memory_space<vmem>>, %arg33: memref<1x1xf32, #tpu.memory_space<vmem>>, %arg34: memref<2x1xf32, #tpu.memory_space<vmem>>, %arg35: memref<32x32xf32, #tpu.memory_space<vmem>>) attributes {dimension_semantics = [#tpu.dimension_semantics<arbitrary>], iteration_bounds = array<i64: 2>, scalar_prefetch = 0 : i64, scratch_operands = 1 : i64, tpu.core_type = #tpu.core_type<tc>, window_params = [{pipeline_mode = #tpu.pipeline_mode<synchronous>, transform_indices = @transform_0, window_bounds = array<i64: 2, 1, 1>}, {pipeline_mode = #tpu.pipeline_mode<synchronous>, transform_indices = @transform_1, window_bounds = array<i64: 32, 17>}, {pipeline_mode = #tpu.pipeline_mode<synchronous>, transform_indices = @transform_2, window_bounds = array<i64: 17, 32>}, {pipeline_mode = #tpu.pipeline_mode<synchronous>, transform_indices = @transform_3, window_bounds = array<i64: 1, 32>}, {pipeline_mode = #tpu.pipeline_mode<synchronous>, transform_indices = @transform_4, window_bounds = array<i64: 32, 32>}, {pipeline_mode = #tpu.pipeline_mode<synchronous>, transform_indices = @transform_5, window_bounds = array<i64: 1, 32>}, {pipeline_mode = #tpu.pipeline_mode<synchronous>, transform_indices = @transform_6, window_bounds = array<i64: 1, 32>}, {pipeline_mode = #tpu.pipeline_mode<synchronous>, transform_indices = @transform_7, window_bounds = array<i64: 1, 32>}, {pipeline_mode = #tpu.pipeline_mode<synchronous>, transform_indices = @transform_8, window_bounds = array<i64: 16, 32>}, {transform_indices = @transform_9, window_bounds = array<i64: 1, 32, 32>}, {transform_indices = @transform_10, window_bounds = array<i64: 1, 1, 32>}, {transform_indices = @transform_11, window_bounds = array<i64: 1, 32, 32>}, {transform_indices = @transform_12, window_bounds = array<i64: 1, 1, 32>}, {transform_indices = @transform_13, window_bounds = array<i64: 1, 32, 32>}, {transform_indices = @transform_14, window_bounds = array<i64: 1, 1, 32>}, {transform_indices = @transform_15, window_bounds = array<i64: 1, 32, 32>}, {transform_indices = @transform_16, window_bounds = array<i64: 1, 1, 32>}, {transform_indices = @transform_17, window_bounds = array<i64: 1, 1, 32>}, {transform_indices = @transform_18, window_bounds = array<i64: 1, 1, 32>}, {transform_indices = @transform_19, window_bounds = array<i64: 1, 32, 128>}, {transform_indices = @transform_20, window_bounds = array<i64: 1, 1, 128>}, {transform_indices = @transform_21, window_bounds = array<i64: 1, 128, 32>}, {transform_indices = @transform_22, window_bounds = array<i64: 1, 1, 32>}, {transform_indices = @transform_23, window_bounds = array<i64: 1, 1, 32>}, {transform_indices = @transform_24, window_bounds = array<i64: 1, 1, 32>}, {pipeline_mode = #tpu.pipeline_mode<synchronous>, transform_indices = @transform_25, window_bounds = array<i64: 32, 64>}, {pipeline_mode = #tpu.pipeline_mode<synchronous>, transform_indices = @transform_26, window_bounds = array<i64: 1, 64>}, {pipeline_mode = #tpu.pipeline_mode<synchronous>, transform_indices = @transform_27, window_bounds = array<i64: 1, 64>}, {pipeline_mode = #tpu.pipeline_mode<synchronous>, transform_indices = @transform_28, window_bounds = array<i64: 1, 64>}, {pipeline_mode = #tpu.pipeline_mode<synchronous>, transform_indices = @transform_29, window_bounds = array<i64: 1, 64>}, {pipeline_mode = #tpu.pipeline_mode<synchronous>, transform_indices = @transform_30, window_bounds = array<i64: 1, 64>}, {pipeline_mode = #tpu.pipeline_mode<synchronous>, transform_indices = @transform_31, window_bounds = array<i64: 64, 1>}, {pipeline_mode = #tpu.pipeline_mode<synchronous>, transform_indices = @transform_32, window_bounds = array<i64: 1, 1>}, {pipeline_mode = #tpu.pipeline_mode<synchronous>, transform_indices = @transform_33, window_bounds = array<i64: 2, 1>}]} {
    %c0 = arith.constant 0 : index
    %c0_0 = arith.constant 0 : index
    %c0_1 = arith.constant 0 : index
    %0 = vector.load %arg1[%c0, %c0_0, %c0_1] : memref<2x1x1xi32, #tpu.memory_space<vmem>>, vector<2x1x1xi32>
    %1 = tpu.iota {dimensions = array<i32: 2>} : vector<1x1x16xi32>
    %2 = tpu.iota {dimensions = array<i32: 1>} : vector<1x16x1xi32>
    %3 = vector.broadcast %1 : vector<1x1x16xi32> to vector<2x1x16xi32>
    %4 = vector.broadcast %0 : vector<2x1x1xi32> to vector<2x1x16xi32>
    %5 = arith.cmpi slt, %3, %4 : vector<2x1x16xi32>
    %cst = arith.constant 0.000000e+00 : f32
    %cst_2 = arith.constant -1.000000e+09 : f32
    %6 = vector.broadcast %cst : f32 to vector<2x1x16xf32>
    %7 = vector.broadcast %cst_2 : f32 to vector<2x1x16xf32>
    %8 = arith.select %5, %6, %7 : vector<2x1x16xi1>, vector<2x1x16xf32>
    %9 = vector.broadcast %2 : vector<1x16x1xi32> to vector<2x16x1xi32>
    %10 = vector.broadcast %0 : vector<2x1x1xi32> to vector<2x16x1xi32>
    %11 = arith.cmpi slt, %9, %10 : vector<2x16x1xi32>
    %12 = arith.extui %11 : vector<2x16x1xi1> to vector<2x16x1xi32>
    %13 = arith.sitofp %12 : vector<2x16x1xi32> to vector<2x16x1xf32>
    %14 = vector.shape_cast %13 : vector<2x16x1xf32> to vector<32x1xf32>
    %c0_i32 = arith.constant 0 : i32
    %15 = arith.cmpi eq, %arg0, %c0_i32 : i32
    %16 = arith.extui %15 : i1 to i32
    %c0_i32_3 = arith.constant 0 : i32
    %17 = arith.cmpi ne, %16, %c0_i32_3 : i32
    scf.if %17 {
      %c0_94 = arith.constant 0 : index
      %c0_95 = arith.constant 0 : index
      %217 = vector.load %arg2[%c0_94, %c0_95] : memref<32x17xbf16, #tpu.memory_space<vmem>>, vector<32x17xbf16>
      %c0_96 = arith.constant 0 : index
      %c0_97 = arith.constant 0 : index
      %218 = vector.load %arg3[%c0_96, %c0_97] : memref<17x32xbf16, #tpu.memory_space<vmem>>, vector<17x32xbf16>
      %cst_98 = arith.constant dense<0.000000e+00> : vector<32x32xf32>
      %219 = tpu.matmul %217, %218, %cst_98 {dimension_numbers = #tpu.dot_dimension_numbers<[1], [0], [0], [1], [0, 0, 1, 1], [], []>} : vector<32x17xbf16>, vector<17x32xbf16>, vector<32x32xf32> -> vector<32x32xf32>
      %c0_99 = arith.constant 0 : index
      %c0_100 = arith.constant 0 : index
      %220 = vector.load %arg4[%c0_99, %c0_100] : memref<1x32xf32, #tpu.memory_space<vmem>>, vector<1x32xf32>
      %221 = vector.broadcast %220 : vector<1x32xf32> to vector<32x32xf32>
      %222 = arith.addf %219, %221 : vector<32x32xf32>
      %223 = arith.truncf %222 : vector<32x32xf32> to vector<32x32xbf16>
      %c0_101 = arith.constant 0 : index
      %c0_102 = arith.constant 0 : index
      %224 = vector.load %arg5[%c0_101, %c0_102] : memref<32x32xbf16, #tpu.memory_space<vmem>>, vector<32x32xbf16>
      %cst_103 = arith.constant dense<0.000000e+00> : vector<32x32xf32>
      %225 = tpu.matmul %223, %224, %cst_103 {dimension_numbers = #tpu.dot_dimension_numbers<[1], [0], [0], [1], [0, 0, 1, 1], [], []>} : vector<32x32xbf16>, vector<32x32xbf16>, vector<32x32xf32> -> vector<32x32xf32>
      %c0_104 = arith.constant 0 : index
      %c0_105 = arith.constant 0 : index
      %226 = vector.load %arg6[%c0_104, %c0_105] : memref<1x32xf32, #tpu.memory_space<vmem>>, vector<1x32xf32>
      %227 = vector.broadcast %226 : vector<1x32xf32> to vector<32x32xf32>
      %228 = arith.addf %225, %227 : vector<32x32xf32>
      %c0_106 = arith.constant 0 : index
      %c0_107 = arith.constant 0 : index
      %229 = vector.load %arg7[%c0_106, %c0_107] : memref<1x32xf32, #tpu.memory_space<vmem>>, vector<1x32xf32>
      %c0_108 = arith.constant 0 : index
      %c0_109 = arith.constant 0 : index
      %230 = vector.load %arg8[%c0_108, %c0_109] : memref<1x32xf32, #tpu.memory_space<vmem>>, vector<1x32xf32>
      %cst_110 = arith.constant dense<0.000000e+00> : vector<32xf32>
      %231 = vector.multi_reduction <add>, %228, %cst_110 [1] : vector<32x32xf32> to vector<32xf32>
      %232 = vector.shape_cast %231 : vector<32xf32> to vector<32x1xf32>
      %cst_111 = arith.constant 3.200000e+01 : f32
      %233 = vector.broadcast %cst_111 : f32 to vector<32x1xf32>
      %234 = arith.divf %232, %233 : vector<32x1xf32>
      %235 = vector.broadcast %234 : vector<32x1xf32> to vector<32x32xf32>
      %236 = arith.subf %228, %235 : vector<32x32xf32>
      %237 = arith.mulf %236, %236 : vector<32x32xf32>
      %cst_112 = arith.constant dense<0.000000e+00> : vector<32xf32>
      %238 = vector.multi_reduction <add>, %237, %cst_112 [1] : vector<32x32xf32> to vector<32xf32>
      %239 = vector.shape_cast %238 : vector<32xf32> to vector<32x1xf32>
      %cst_113 = arith.constant 3.200000e+01 : f32
      %240 = vector.broadcast %cst_113 : f32 to vector<32x1xf32>
      %241 = arith.divf %239, %240 : vector<32x1xf32>
      %242 = vector.broadcast %234 : vector<32x1xf32> to vector<32x32xf32>
      %243 = arith.subf %228, %242 : vector<32x32xf32>
      %cst_114 = arith.constant 9.99999974E-6 : f32
      %244 = vector.broadcast %cst_114 : f32 to vector<32x1xf32>
      %245 = arith.addf %241, %244 : vector<32x1xf32>
      %246 = math.rsqrt %245 : vector<32x1xf32>
      %247 = vector.broadcast %246 : vector<32x1xf32> to vector<32x32xf32>
      %248 = arith.mulf %243, %247 : vector<32x32xf32>
      %249 = vector.broadcast %229 : vector<1x32xf32> to vector<32x32xf32>
      %250 = arith.mulf %248, %249 : vector<32x32xf32>
      %251 = vector.broadcast %230 : vector<1x32xf32> to vector<32x32xf32>
      %252 = arith.addf %250, %251 : vector<32x32xf32>
      %253 = vector.shape_cast %252 : vector<32x32xf32> to vector<2x16x32xf32>
      %c0_115 = arith.constant 0 : index
      %c0_116 = arith.constant 0 : index
      %254 = vector.load %arg9[%c0_115, %c0_116] : memref<16x32xf32, #tpu.memory_space<vmem>>, vector<16x32xf32>
      %255 = vector.shape_cast %254 : vector<16x32xf32> to vector<1x16x32xf32>
      %256 = vector.broadcast %255 : vector<1x16x32xf32> to vector<2x16x32xf32>
      %257 = arith.addf %253, %256 : vector<2x16x32xf32>
      %258 = vector.shape_cast %257 : vector<2x16x32xf32> to vector<32x32xf32>
      %c0_117 = arith.constant 0 : index
      %c0_118 = arith.constant 0 : index
      %259 = vector.load %arg35[%c0_117, %c0_118] : memref<32x32xf32, #tpu.memory_space<vmem>>, vector<32x32xf32>
      tpu.vector_store %arg35[%c0_117, %c0_118], %258 {strides = array<i32>} : memref<32x32xf32, #tpu.memory_space<vmem>>, vector<32x32xf32>,
    } else {
    }
    %c0_4 = arith.constant 0 : index
    %c0_5 = arith.constant 0 : index
    %18 = vector.load %arg35[%c0_4, %c0_5] : memref<32x32xf32, #tpu.memory_space<vmem>>, vector<32x32xf32>
    %19 = arith.truncf %18 : vector<32x32xf32> to vector<32x32xbf16>
    %c0_6 = arith.constant 0 : index
    %c0_7 = arith.constant 0 : index
    %c0_8 = arith.constant 0 : index
    %20 = vector.load %arg10[%c0_6, %c0_7, %c0_8] : memref<1x32x32xbf16, #tpu.memory_space<vmem>>, vector<1x32x32xbf16>
    %21 = vector.shape_cast %20 : vector<1x32x32xbf16> to vector<32x32xbf16>
    %cst_9 = arith.constant dense<0.000000e+00> : vector<32x32xf32>
    %22 = tpu.matmul %19, %21, %cst_9 {dimension_numbers = #tpu.dot_dimension_numbers<[1], [0], [0], [1], [0, 0, 1, 1], [], []>} : vector<32x32xbf16>, vector<32x32xbf16>, vector<32x32xf32> -> vector<32x32xf32>
    %c0_10 = arith.constant 0 : index
    %c0_11 = arith.constant 0 : index
    %c0_12 = arith.constant 0 : index
    %23 = vector.load %arg11[%c0_10, %c0_11, %c0_12] : memref<1x1x32xf32, #tpu.memory_space<vmem>>, vector<1x1x32xf32>
    %24 = vector.shape_cast %23 : vector<1x1x32xf32> to vector<1x32xf32>
    %25 = vector.broadcast %24 : vector<1x32xf32> to vector<32x32xf32>
    %26 = arith.addf %22, %25 : vector<32x32xf32>
    %c0_13 = arith.constant 0 : index
    %c0_14 = arith.constant 0 : index
    %c0_15 = arith.constant 0 : index
    %27 = vector.load %arg12[%c0_13, %c0_14, %c0_15] : memref<1x32x32xbf16, #tpu.memory_space<vmem>>, vector<1x32x32xbf16>
    %28 = vector.shape_cast %27 : vector<1x32x32xbf16> to vector<32x32xbf16>
    %cst_16 = arith.constant dense<0.000000e+00> : vector<32x32xf32>
    %29 = tpu.matmul %19, %28, %cst_16 {dimension_numbers = #tpu.dot_dimension_numbers<[1], [0], [0], [1], [0, 0, 1, 1], [], []>} : vector<32x32xbf16>, vector<32x32xbf16>, vector<32x32xf32> -> vector<32x32xf32>
    %c0_17 = arith.constant 0 : index
    %c0_18 = arith.constant 0 : index
    %c0_19 = arith.constant 0 : index
    %30 = vector.load %arg13[%c0_17, %c0_18, %c0_19] : memref<1x1x32xf32, #tpu.memory_space<vmem>>, vector<1x1x32xf32>
    %31 = vector.shape_cast %30 : vector<1x1x32xf32> to vector<1x32xf32>
    %32 = vector.broadcast %31 : vector<1x32xf32> to vector<32x32xf32>
    %33 = arith.addf %29, %32 : vector<32x32xf32>
    %c0_20 = arith.constant 0 : index
    %c0_21 = arith.constant 0 : index
    %c0_22 = arith.constant 0 : index
    %34 = vector.load %arg14[%c0_20, %c0_21, %c0_22] : memref<1x32x32xbf16, #tpu.memory_space<vmem>>, vector<1x32x32xbf16>
    %35 = vector.shape_cast %34 : vector<1x32x32xbf16> to vector<32x32xbf16>
    %cst_23 = arith.constant dense<0.000000e+00> : vector<32x32xf32>
    %36 = tpu.matmul %19, %35, %cst_23 {dimension_numbers = #tpu.dot_dimension_numbers<[1], [0], [0], [1], [0, 0, 1, 1], [], []>} : vector<32x32xbf16>, vector<32x32xbf16>, vector<32x32xf32> -> vector<32x32xf32>
    %c0_24 = arith.constant 0 : index
    %c0_25 = arith.constant 0 : index
    %c0_26 = arith.constant 0 : index
    %37 = vector.load %arg15[%c0_24, %c0_25, %c0_26] : memref<1x1x32xf32, #tpu.memory_space<vmem>>, vector<1x1x32xf32>
    %38 = vector.shape_cast %37 : vector<1x1x32xf32> to vector<1x32xf32>
    %39 = vector.broadcast %38 : vector<1x32xf32> to vector<32x32xf32>
    %40 = arith.addf %36, %39 : vector<32x32xf32>
    %41 = vector.shape_cast %26 : vector<32x32xf32> to vector<2x16x32xf32>
    %42 = arith.truncf %41 : vector<2x16x32xf32> to vector<2x16x32xbf16>
    %43 = vector.shape_cast %33 : vector<32x32xf32> to vector<2x16x32xf32>
    %44 = arith.truncf %43 : vector<2x16x32xf32> to vector<2x16x32xbf16>
    %45 = vector.shape_cast %40 : vector<32x32xf32> to vector<2x16x32xf32>
    %46 = arith.truncf %45 : vector<2x16x32xf32> to vector<2x16x32xbf16>
    %47 = vector.extract_strided_slice %42 {offsets = [0, 0, 0], sizes = [2, 16, 8], strides = [1, 1, 1]} : vector<2x16x32xbf16> to vector<2x16x8xbf16>
    %48 = vector.extract_strided_slice %44 {offsets = [0, 0, 0], sizes = [2, 16, 8], strides = [1, 1, 1]} : vector<2x16x32xbf16> to vector<2x16x8xbf16>
    %49 = vector.extract_strided_slice %46 {offsets = [0, 0, 0], sizes = [2, 16, 8], strides = [1, 1, 1]} : vector<2x16x32xbf16> to vector<2x16x8xbf16>
    "tpu.trace_start"() <{level = 10 : i32, message = "bqd,bkd->bqk"}> : () -> ()
    %cst_27 = arith.constant dense<0.000000e+00> : vector<2x16x16xf32>
    %50 = tpu.matmul %47, %48, %cst_27 {dimension_numbers = #tpu.dot_dimension_numbers<[2], [2], [1], [1], [0, 0, 0, 1, 1, 1], [0], [0]>} : vector<2x16x8xbf16>, vector<2x16x8xbf16>, vector<2x16x16xf32> -> vector<2x16x16xf32>
    "tpu.trace_stop"() : () -> ()
    %cst_28 = arith.constant 0.353553385 : f32
    %51 = vector.broadcast %cst_28 : f32 to vector<2x16x16xf32>
    %52 = arith.mulf %50, %51 : vector<2x16x16xf32>
    %53 = vector.broadcast %8 : vector<2x1x16xf32> to vector<2x16x16xf32>
    %54 = arith.addf %52, %53 : vector<2x16x16xf32>
    %cst_29 = arith.constant dense<0xFF800000> : vector<2x16xf32>
    %55 = vector.multi_reduction <maximumf>, %54, %cst_29 [2] : vector<2x16x16xf32> to vector<2x16xf32>
    %56 = vector.shape_cast %55 : vector<2x16xf32> to vector<2x16x1xf32>
    %57 = vector.broadcast %56 : vector<2x16x1xf32> to vector<2x16x16xf32>
    %58 = arith.subf %54, %57 : vector<2x16x16xf32>
    %59 = math.exp %58 : vector<2x16x16xf32>
    %cst_30 = arith.constant dense<0.000000e+00> : vector<2x16xf32>
    %60 = vector.multi_reduction <add>, %59, %cst_30 [2] : vector<2x16x16xf32> to vector<2x16xf32>
    %61 = vector.shape_cast %60 : vector<2x16xf32> to vector<2x16x1xf32>
    %62 = tpu.reciprocal %61 {approx = true} : vector<2x16x1xf32> -> vector<2x16x1xf32>
    %63 = vector.broadcast %62 : vector<2x16x1xf32> to vector<2x16x16xf32>
    %64 = arith.mulf %59, %63 : vector<2x16x16xf32>
    %65 = arith.truncf %64 : vector<2x16x16xf32> to vector<2x16x16xbf16>
    "tpu.trace_start"() <{level = 10 : i32, message = "bqk,bkd->bqd"}> : () -> ()
    %cst_31 = arith.constant dense<0.000000e+00> : vector<2x16x8xf32>
    %66 = tpu.matmul %65, %49, %cst_31 {dimension_numbers = #tpu.dot_dimension_numbers<[2], [1], [1], [2], [0, 0, 0, 1, 1, 2], [0], [0]>} : vector<2x16x16xbf16>, vector<2x16x8xbf16>, vector<2x16x8xf32> -> vector<2x16x8xf32>
    "tpu.trace_stop"() : () -> ()
    %67 = vector.extract_strided_slice %42 {offsets = [0, 0, 8], sizes = [2, 16, 8], strides = [1, 1, 1]} : vector<2x16x32xbf16> to vector<2x16x8xbf16>
    %68 = vector.extract_strided_slice %44 {offsets = [0, 0, 8], sizes = [2, 16, 8], strides = [1, 1, 1]} : vector<2x16x32xbf16> to vector<2x16x8xbf16>
    %69 = vector.extract_strided_slice %46 {offsets = [0, 0, 8], sizes = [2, 16, 8], strides = [1, 1, 1]} : vector<2x16x32xbf16> to vector<2x16x8xbf16>
    "tpu.trace_start"() <{level = 10 : i32, message = "bqd,bkd->bqk"}> : () -> ()
    %cst_32 = arith.constant dense<0.000000e+00> : vector<2x16x16xf32>
    %70 = tpu.matmul %67, %68, %cst_32 {dimension_numbers = #tpu.dot_dimension_numbers<[2], [2], [1], [1], [0, 0, 0, 1, 1, 1], [0], [0]>} : vector<2x16x8xbf16>, vector<2x16x8xbf16>, vector<2x16x16xf32> -> vector<2x16x16xf32>
    "tpu.trace_stop"() : () -> ()
    %cst_33 = arith.constant 0.353553385 : f32
    %71 = vector.broadcast %cst_33 : f32 to vector<2x16x16xf32>
    %72 = arith.mulf %70, %71 : vector<2x16x16xf32>
    %73 = vector.broadcast %8 : vector<2x1x16xf32> to vector<2x16x16xf32>
    %74 = arith.addf %72, %73 : vector<2x16x16xf32>
    %cst_34 = arith.constant dense<0xFF800000> : vector<2x16xf32>
    %75 = vector.multi_reduction <maximumf>, %74, %cst_34 [2] : vector<2x16x16xf32> to vector<2x16xf32>
    %76 = vector.shape_cast %75 : vector<2x16xf32> to vector<2x16x1xf32>
    %77 = vector.broadcast %76 : vector<2x16x1xf32> to vector<2x16x16xf32>
    %78 = arith.subf %74, %77 : vector<2x16x16xf32>
    %79 = math.exp %78 : vector<2x16x16xf32>
    %cst_35 = arith.constant dense<0.000000e+00> : vector<2x16xf32>
    %80 = vector.multi_reduction <add>, %79, %cst_35 [2] : vector<2x16x16xf32> to vector<2x16xf32>
    %81 = vector.shape_cast %80 : vector<2x16xf32> to vector<2x16x1xf32>
    %82 = tpu.reciprocal %81 {approx = true} : vector<2x16x1xf32> -> vector<2x16x1xf32>
    %83 = vector.broadcast %82 : vector<2x16x1xf32> to vector<2x16x16xf32>
    %84 = arith.mulf %79, %83 : vector<2x16x16xf32>
    %85 = arith.truncf %84 : vector<2x16x16xf32> to vector<2x16x16xbf16>
    "tpu.trace_start"() <{level = 10 : i32, message = "bqk,bkd->bqd"}> : () -> ()
    %cst_36 = arith.constant dense<0.000000e+00> : vector<2x16x8xf32>
    %86 = tpu.matmul %85, %69, %cst_36 {dimension_numbers = #tpu.dot_dimension_numbers<[2], [1], [1], [2], [0, 0, 0, 1, 1, 2], [0], [0]>} : vector<2x16x16xbf16>, vector<2x16x8xbf16>, vector<2x16x8xf32> -> vector<2x16x8xf32>
    "tpu.trace_stop"() : () -> ()
    %87 = vector.extract_strided_slice %42 {offsets = [0, 0, 16], sizes = [2, 16, 8], strides = [1, 1, 1]} : vector<2x16x32xbf16> to vector<2x16x8xbf16>
    %88 = vector.extract_strided_slice %44 {offsets = [0, 0, 16], sizes = [2, 16, 8], strides = [1, 1, 1]} : vector<2x16x32xbf16> to vector<2x16x8xbf16>
    %89 = vector.extract_strided_slice %46 {offsets = [0, 0, 16], sizes = [2, 16, 8], strides = [1, 1, 1]} : vector<2x16x32xbf16> to vector<2x16x8xbf16>
    "tpu.trace_start"() <{level = 10 : i32, message = "bqd,bkd->bqk"}> : () -> ()
    %cst_37 = arith.constant dense<0.000000e+00> : vector<2x16x16xf32>
    %90 = tpu.matmul %87, %88, %cst_37 {dimension_numbers = #tpu.dot_dimension_numbers<[2], [2], [1], [1], [0, 0, 0, 1, 1, 1], [0], [0]>} : vector<2x16x8xbf16>, vector<2x16x8xbf16>, vector<2x16x16xf32> -> vector<2x16x16xf32>
    "tpu.trace_stop"() : () -> ()
    %cst_38 = arith.constant 0.353553385 : f32
    %91 = vector.broadcast %cst_38 : f32 to vector<2x16x16xf32>
    %92 = arith.mulf %90, %91 : vector<2x16x16xf32>
    %93 = vector.broadcast %8 : vector<2x1x16xf32> to vector<2x16x16xf32>
    %94 = arith.addf %92, %93 : vector<2x16x16xf32>
    %cst_39 = arith.constant dense<0xFF800000> : vector<2x16xf32>
    %95 = vector.multi_reduction <maximumf>, %94, %cst_39 [2] : vector<2x16x16xf32> to vector<2x16xf32>
    %96 = vector.shape_cast %95 : vector<2x16xf32> to vector<2x16x1xf32>
    %97 = vector.broadcast %96 : vector<2x16x1xf32> to vector<2x16x16xf32>
    %98 = arith.subf %94, %97 : vector<2x16x16xf32>
    %99 = math.exp %98 : vector<2x16x16xf32>
    %cst_40 = arith.constant dense<0.000000e+00> : vector<2x16xf32>
    %100 = vector.multi_reduction <add>, %99, %cst_40 [2] : vector<2x16x16xf32> to vector<2x16xf32>
    %101 = vector.shape_cast %100 : vector<2x16xf32> to vector<2x16x1xf32>
    %102 = tpu.reciprocal %101 {approx = true} : vector<2x16x1xf32> -> vector<2x16x1xf32>
    %103 = vector.broadcast %102 : vector<2x16x1xf32> to vector<2x16x16xf32>
    %104 = arith.mulf %99, %103 : vector<2x16x16xf32>
    %105 = arith.truncf %104 : vector<2x16x16xf32> to vector<2x16x16xbf16>
    "tpu.trace_start"() <{level = 10 : i32, message = "bqk,bkd->bqd"}> : () -> ()
    %cst_41 = arith.constant dense<0.000000e+00> : vector<2x16x8xf32>
    %106 = tpu.matmul %105, %89, %cst_41 {dimension_numbers = #tpu.dot_dimension_numbers<[2], [1], [1], [2], [0, 0, 0, 1, 1, 2], [0], [0]>} : vector<2x16x16xbf16>, vector<2x16x8xbf16>, vector<2x16x8xf32> -> vector<2x16x8xf32>
    "tpu.trace_stop"() : () -> ()
    %107 = vector.extract_strided_slice %42 {offsets = [0, 0, 24], sizes = [2, 16, 8], strides = [1, 1, 1]} : vector<2x16x32xbf16> to vector<2x16x8xbf16>
    %108 = vector.extract_strided_slice %44 {offsets = [0, 0, 24], sizes = [2, 16, 8], strides = [1, 1, 1]} : vector<2x16x32xbf16> to vector<2x16x8xbf16>
    %109 = vector.extract_strided_slice %46 {offsets = [0, 0, 24], sizes = [2, 16, 8], strides = [1, 1, 1]} : vector<2x16x32xbf16> to vector<2x16x8xbf16>
    "tpu.trace_start"() <{level = 10 : i32, message = "bqd,bkd->bqk"}> : () -> ()
    %cst_42 = arith.constant dense<0.000000e+00> : vector<2x16x16xf32>
    %110 = tpu.matmul %107, %108, %cst_42 {dimension_numbers = #tpu.dot_dimension_numbers<[2], [2], [1], [1], [0, 0, 0, 1, 1, 1], [0], [0]>} : vector<2x16x8xbf16>, vector<2x16x8xbf16>, vector<2x16x16xf32> -> vector<2x16x16xf32>
    "tpu.trace_stop"() : () -> ()
    %cst_43 = arith.constant 0.353553385 : f32
    %111 = vector.broadcast %cst_43 : f32 to vector<2x16x16xf32>
    %112 = arith.mulf %110, %111 : vector<2x16x16xf32>
    %113 = vector.broadcast %8 : vector<2x1x16xf32> to vector<2x16x16xf32>
    %114 = arith.addf %112, %113 : vector<2x16x16xf32>
    %cst_44 = arith.constant dense<0xFF800000> : vector<2x16xf32>
    %115 = vector.multi_reduction <maximumf>, %114, %cst_44 [2] : vector<2x16x16xf32> to vector<2x16xf32>
    %116 = vector.shape_cast %115 : vector<2x16xf32> to vector<2x16x1xf32>
    %117 = vector.broadcast %116 : vector<2x16x1xf32> to vector<2x16x16xf32>
    %118 = arith.subf %114, %117 : vector<2x16x16xf32>
    %119 = math.exp %118 : vector<2x16x16xf32>
    %cst_45 = arith.constant dense<0.000000e+00> : vector<2x16xf32>
    %120 = vector.multi_reduction <add>, %119, %cst_45 [2] : vector<2x16x16xf32> to vector<2x16xf32>
    %121 = vector.shape_cast %120 : vector<2x16xf32> to vector<2x16x1xf32>
    %122 = tpu.reciprocal %121 {approx = true} : vector<2x16x1xf32> -> vector<2x16x1xf32>
    %123 = vector.broadcast %122 : vector<2x16x1xf32> to vector<2x16x16xf32>
    %124 = arith.mulf %119, %123 : vector<2x16x16xf32>
    %125 = arith.truncf %124 : vector<2x16x16xf32> to vector<2x16x16xbf16>
    "tpu.trace_start"() <{level = 10 : i32, message = "bqk,bkd->bqd"}> : () -> ()
    %cst_46 = arith.constant dense<0.000000e+00> : vector<2x16x8xf32>
    %126 = tpu.matmul %125, %109, %cst_46 {dimension_numbers = #tpu.dot_dimension_numbers<[2], [1], [1], [2], [0, 0, 0, 1, 1, 2], [0], [0]>} : vector<2x16x16xbf16>, vector<2x16x8xbf16>, vector<2x16x8xf32> -> vector<2x16x8xf32>
    "tpu.trace_stop"() : () -> ()
    %127 = tpu.concatenate %66, %86, %106, %126 in 2 : vector<2x16x8xf32>, vector<2x16x8xf32>, vector<2x16x8xf32>, vector<2x16x8xf32> -> vector<2x16x32xf32>
    %128 = vector.shape_cast %127 : vector<2x16x32xf32> to vector<32x32xf32>
    %129 = arith.truncf %128 : vector<32x32xf32> to vector<32x32xbf16>
    %c0_47 = arith.constant 0 : index
    %c0_48 = arith.constant 0 : index
    %c0_49 = arith.constant 0 : index
    %130 = vector.load %arg16[%c0_47, %c0_48, %c0_49] : memref<1x32x32xbf16, #tpu.memory_space<vmem>>, vector<1x32x32xbf16>
    %131 = vector.shape_cast %130 : vector<1x32x32xbf16> to vector<32x32xbf16>
    %cst_50 = arith.constant dense<0.000000e+00> : vector<32x32xf32>
    %132 = tpu.matmul %129, %131, %cst_50 {dimension_numbers = #tpu.dot_dimension_numbers<[1], [0], [0], [1], [0, 0, 1, 1], [], []>} : vector<32x32xbf16>, vector<32x32xbf16>, vector<32x32xf32> -> vector<32x32xf32>
    %c0_51 = arith.constant 0 : index
    %c0_52 = arith.constant 0 : index
    %c0_53 = arith.constant 0 : index
    %133 = vector.load %arg17[%c0_51, %c0_52, %c0_53] : memref<1x1x32xf32, #tpu.memory_space<vmem>>, vector<1x1x32xf32>
    %134 = vector.shape_cast %133 : vector<1x1x32xf32> to vector<1x32xf32>
    %135 = vector.broadcast %134 : vector<1x32xf32> to vector<32x32xf32>
    %136 = arith.addf %132, %135 : vector<32x32xf32>
    %137 = arith.addf %136, %18 : vector<32x32xf32>
    %c0_54 = arith.constant 0 : index
    %c0_55 = arith.constant 0 : index
    %c0_56 = arith.constant 0 : index
    %138 = vector.load %arg18[%c0_54, %c0_55, %c0_56] : memref<1x1x32xf32, #tpu.memory_space<vmem>>, vector<1x1x32xf32>
    %139 = vector.shape_cast %138 : vector<1x1x32xf32> to vector<1x32xf32>
    %c0_57 = arith.constant 0 : index
    %c0_58 = arith.constant 0 : index
    %c0_59 = arith.constant 0 : index
    %140 = vector.load %arg19[%c0_57, %c0_58, %c0_59] : memref<1x1x32xf32, #tpu.memory_space<vmem>>, vector<1x1x32xf32>
    %141 = vector.shape_cast %140 : vector<1x1x32xf32> to vector<1x32xf32>
    %cst_60 = arith.constant dense<0.000000e+00> : vector<32xf32>
    %142 = vector.multi_reduction <add>, %137, %cst_60 [1] : vector<32x32xf32> to vector<32xf32>
    %143 = vector.shape_cast %142 : vector<32xf32> to vector<32x1xf32>
    %cst_61 = arith.constant 3.200000e+01 : f32
    %144 = vector.broadcast %cst_61 : f32 to vector<32x1xf32>
    %145 = arith.divf %143, %144 : vector<32x1xf32>
    %146 = vector.broadcast %145 : vector<32x1xf32> to vector<32x32xf32>
    %147 = arith.subf %137, %146 : vector<32x32xf32>
    %148 = arith.mulf %147, %147 : vector<32x32xf32>
    %cst_62 = arith.constant dense<0.000000e+00> : vector<32xf32>
    %149 = vector.multi_reduction <add>, %148, %cst_62 [1] : vector<32x32xf32> to vector<32xf32>
    %150 = vector.shape_cast %149 : vector<32xf32> to vector<32x1xf32>
    %cst_63 = arith.constant 3.200000e+01 : f32
    %151 = vector.broadcast %cst_63 : f32 to vector<32x1xf32>
    %152 = arith.divf %150, %151 : vector<32x1xf32>
    %153 = vector.broadcast %145 : vector<32x1xf32> to vector<32x32xf32>
    %154 = arith.subf %137, %153 : vector<32x32xf32>
    %cst_64 = arith.constant 9.99999974E-6 : f32
    %155 = vector.broadcast %cst_64 : f32 to vector<32x1xf32>
    %156 = arith.addf %152, %155 : vector<32x1xf32>
    %157 = math.rsqrt %156 : vector<32x1xf32>
    %158 = vector.broadcast %157 : vector<32x1xf32> to vector<32x32xf32>
    %159 = arith.mulf %154, %158 : vector<32x32xf32>
    %160 = vector.broadcast %139 : vector<1x32xf32> to vector<32x32xf32>
    %161 = arith.mulf %159, %160 : vector<32x32xf32>
    %162 = vector.broadcast %141 : vector<1x32xf32> to vector<32x32xf32>
    %163 = arith.addf %161, %162 : vector<32x32xf32>
    %164 = vector.broadcast %14 : vector<32x1xf32> to vector<32x32xf32>
    %165 = arith.mulf %163, %164 : vector<32x32xf32>
    %166 = arith.truncf %165 : vector<32x32xf32> to vector<32x32xbf16>
    %c0_65 = arith.constant 0 : index
    %c0_66 = arith.constant 0 : index
    %c0_67 = arith.constant 0 : index
    %167 = vector.load %arg20[%c0_65, %c0_66, %c0_67] : memref<1x32x128xbf16, #tpu.memory_space<vmem>>, vector<1x32x128xbf16>
    %168 = vector.shape_cast %167 : vector<1x32x128xbf16> to vector<32x128xbf16>
    %cst_68 = arith.constant dense<0.000000e+00> : vector<32x128xf32>
    %169 = tpu.matmul %166, %168, %cst_68 {dimension_numbers = #tpu.dot_dimension_numbers<[1], [0], [0], [1], [0, 0, 1, 1], [], []>} : vector<32x32xbf16>, vector<32x128xbf16>, vector<32x128xf32> -> vector<32x128xf32>
    %c0_69 = arith.constant 0 : index
    %c0_70 = arith.constant 0 : index
    %c0_71 = arith.constant 0 : index
    %170 = vector.load %arg21[%c0_69, %c0_70, %c0_71] : memref<1x1x128xf32, #tpu.memory_space<vmem>>, vector<1x1x128xf32>
    %171 = vector.shape_cast %170 : vector<1x1x128xf32> to vector<1x128xf32>
    %172 = vector.broadcast %171 : vector<1x128xf32> to vector<32x128xf32>
    %173 = arith.addf %169, %172 : vector<32x128xf32>
    %cst_72 = arith.constant 0.000000e+00 : f32
    %174 = vector.broadcast %cst_72 : f32 to vector<32x128xf32>
    %175 = arith.maximumf %173, %174 : vector<32x128xf32>
    %176 = arith.truncf %175 : vector<32x128xf32> to vector<32x128xbf16>
    %c0_73 = arith.constant 0 : index
    %c0_74 = arith.constant 0 : index
    %c0_75 = arith.constant 0 : index
    %177 = vector.load %arg22[%c0_73, %c0_74, %c0_75] : memref<1x128x32xbf16, #tpu.memory_space<vmem>>, vector<1x128x32xbf16>
    %178 = vector.shape_cast %177 : vector<1x128x32xbf16> to vector<128x32xbf16>
    %cst_76 = arith.constant dense<0.000000e+00> : vector<32x32xf32>
    %179 = tpu.matmul %176, %178, %cst_76 {dimension_numbers = #tpu.dot_dimension_numbers<[1], [0], [0], [1], [0, 0, 1, 1], [], []>} : vector<32x128xbf16>, vector<128x32xbf16>, vector<32x32xf32> -> vector<32x32xf32>
    %c0_77 = arith.constant 0 : index
    %c0_78 = arith.constant 0 : index
    %c0_79 = arith.constant 0 : index
    %180 = vector.load %arg23[%c0_77, %c0_78, %c0_79] : memref<1x1x32xf32, #tpu.memory_space<vmem>>, vector<1x1x32xf32>
    %181 = vector.shape_cast %180 : vector<1x1x32xf32> to vector<1x32xf32>
    %182 = vector.broadcast %181 : vector<1x32xf32> to vector<32x32xf32>
    %183 = arith.addf %179, %182 : vector<32x32xf32>
    %184 = arith.addf %183, %165 : vector<32x32xf32>
    %c0_80 = arith.constant 0 : index
    %c0_81 = arith.constant 0 : index
    %c0_82 = arith.constant 0 : index
    %185 = vector.load %arg24[%c0_80, %c0_81, %c0_82] : memref<1x1x32xf32, #tpu.memory_space<vmem>>, vector<1x1x32xf32>
    %186 = vector.shape_cast %185 : vector<1x1x32xf32> to vector<1x32xf32>
    %c0_83 = arith.constant 0 : index
    %c0_84 = arith.constant 0 : index
    %c0_85 = arith.constant 0 : index
    %187 = vector.load %arg25[%c0_83, %c0_84, %c0_85] : memref<1x1x32xf32, #tpu.memory_space<vmem>>, vector<1x1x32xf32>
    %188 = vector.shape_cast %187 : vector<1x1x32xf32> to vector<1x32xf32>
    %cst_86 = arith.constant dense<0.000000e+00> : vector<32xf32>
    %189 = vector.multi_reduction <add>, %184, %cst_86 [1] : vector<32x32xf32> to vector<32xf32>
    %190 = vector.shape_cast %189 : vector<32xf32> to vector<32x1xf32>
    %cst_87 = arith.constant 3.200000e+01 : f32
    %191 = vector.broadcast %cst_87 : f32 to vector<32x1xf32>
    %192 = arith.divf %190, %191 : vector<32x1xf32>
    %193 = vector.broadcast %192 : vector<32x1xf32> to vector<32x32xf32>
    %194 = arith.subf %184, %193 : vector<32x32xf32>
    %195 = arith.mulf %194, %194 : vector<32x32xf32>
    %cst_88 = arith.constant dense<0.000000e+00> : vector<32xf32>
    %196 = vector.multi_reduction <add>, %195, %cst_88 [1] : vector<32x32xf32> to vector<32xf32>
    %197 = vector.shape_cast %196 : vector<32xf32> to vector<32x1xf32>
    %cst_89 = arith.constant 3.200000e+01 : f32
    %198 = vector.broadcast %cst_89 : f32 to vector<32x1xf32>
    %199 = arith.divf %197, %198 : vector<32x1xf32>
    %200 = vector.broadcast %192 : vector<32x1xf32> to vector<32x32xf32>
    %201 = arith.subf %184, %200 : vector<32x32xf32>
    %cst_90 = arith.constant 9.99999974E-6 : f32
    %202 = vector.broadcast %cst_90 : f32 to vector<32x1xf32>
    %203 = arith.addf %199, %202 : vector<32x1xf32>
    %204 = math.rsqrt %203 : vector<32x1xf32>
    %205 = vector.broadcast %204 : vector<32x1xf32> to vector<32x32xf32>
    %206 = arith.mulf %201, %205 : vector<32x32xf32>
    %207 = vector.broadcast %186 : vector<1x32xf32> to vector<32x32xf32>
    %208 = arith.mulf %206, %207 : vector<32x32xf32>
    %209 = vector.broadcast %188 : vector<1x32xf32> to vector<32x32xf32>
    %210 = arith.addf %208, %209 : vector<32x32xf32>
    %211 = vector.broadcast %14 : vector<32x1xf32> to vector<32x32xf32>
    %212 = arith.mulf %210, %211 : vector<32x32xf32>
    %c0_91 = arith.constant 0 : index
    %c0_92 = arith.constant 0 : index
    %213 = vector.load %arg35[%c0_91, %c0_92] : memref<32x32xf32, #tpu.memory_space<vmem>>, vector<32x32xf32>
    tpu.vector_store %arg35[%c0_91, %c0_92], %212 {strides = array<i32>} : memref<32x32xf32, #tpu.memory_space<vmem>>, vector<32x32xf32>,
    %c1_i32 = arith.constant 1 : i32
    %214 = arith.cmpi eq, %arg0, %c1_i32 : i32
    %215 = arith.extui %214 : i1 to i32
    %c0_i32_93 = arith.constant 0 : i32
    %216 = arith.cmpi ne, %215, %c0_i32_93 : i32
    scf.if %216 {
      %217 = tpu.iota {dimensions = array<i32: 0>} : vector<2x32xi32>
      %218 = tpu.iota {dimensions = array<i32: 1>} : vector<2x32xi32>
      %c16_i32 = arith.constant 16 : i32
      %219 = vector.broadcast %c16_i32 : i32 to vector<2x32xi32>
      %220 = arith.muli %217, %219 : vector<2x32xi32>
      %221 = arith.cmpi eq, %218, %220 : vector<2x32xi32>
      %222 = arith.extui %221 : vector<2x32xi1> to vector<2x32xi32>
      %223 = arith.sitofp %222 : vector<2x32xi32> to vector<2x32xf32>
      %cst_94 = arith.constant dense<0.000000e+00> : vector<2x32xf32>
      %224 = tpu.matmul %223, %212, %cst_94 {dimension_numbers = #tpu.dot_dimension_numbers<[1], [0], [0], [1], [0, 0, 1, 1], [], []>} : vector<2x32xf32>, vector<32x32xf32>, vector<2x32xf32> -> vector<2x32xf32>
      %225 = arith.truncf %224 : vector<2x32xf32> to vector<2x32xbf16>
      %c0_95 = arith.constant 0 : index
      %c0_96 = arith.constant 0 : index
      %226 = vector.load %arg26[%c0_95, %c0_96] : memref<32x64xbf16, #tpu.memory_space<vmem>>, vector<32x64xbf16>
      %cst_97 = arith.constant dense<0.000000e+00> : vector<2x64xf32>
      %227 = tpu.matmul %225, %226, %cst_97 {dimension_numbers = #tpu.dot_dimension_numbers<[1], [0], [0], [1], [0, 0, 1, 1], [], []>} : vector<2x32xbf16>, vector<32x64xbf16>, vector<2x64xf32> -> vector<2x64xf32>
      %c0_98 = arith.constant 0 : index
      %c0_99 = arith.constant 0 : index
      %228 = vector.load %arg27[%c0_98, %c0_99] : memref<1x64xf32, #tpu.memory_space<vmem>>, vector<1x64xf32>
      %229 = vector.broadcast %228 : vector<1x64xf32> to vector<2x64xf32>
      %230 = arith.addf %227, %229 : vector<2x64xf32>
      %c0_100 = arith.constant 0 : index
      %c0_101 = arith.constant 0 : index
      %231 = vector.load %arg30[%c0_100, %c0_101] : memref<1x64xf32, #tpu.memory_space<vmem>>, vector<1x64xf32>
      %232 = vector.broadcast %231 : vector<1x64xf32> to vector<2x64xf32>
      %233 = arith.subf %230, %232 : vector<2x64xf32>
      %c0_102 = arith.constant 0 : index
      %c0_103 = arith.constant 0 : index
      %234 = vector.load %arg31[%c0_102, %c0_103] : memref<1x64xf32, #tpu.memory_space<vmem>>, vector<1x64xf32>
      %cst_104 = arith.constant 9.99999974E-6 : f32
      %235 = vector.broadcast %cst_104 : f32 to vector<1x64xf32>
      %236 = arith.addf %234, %235 : vector<1x64xf32>
      %237 = math.rsqrt %236 : vector<1x64xf32>
      %238 = vector.broadcast %237 : vector<1x64xf32> to vector<2x64xf32>
      %239 = arith.mulf %233, %238 : vector<2x64xf32>
      %c0_105 = arith.constant 0 : index
      %c0_106 = arith.constant 0 : index
      %240 = vector.load %arg28[%c0_105, %c0_106] : memref<1x64xf32, #tpu.memory_space<vmem>>, vector<1x64xf32>
      %241 = vector.broadcast %240 : vector<1x64xf32> to vector<2x64xf32>
      %242 = arith.mulf %239, %241 : vector<2x64xf32>
      %c0_107 = arith.constant 0 : index
      %c0_108 = arith.constant 0 : index
      %243 = vector.load %arg29[%c0_107, %c0_108] : memref<1x64xf32, #tpu.memory_space<vmem>>, vector<1x64xf32>
      %244 = vector.broadcast %243 : vector<1x64xf32> to vector<2x64xf32>
      %245 = arith.addf %242, %244 : vector<2x64xf32>
      %cst_109 = arith.constant 0.000000e+00 : f32
      %246 = vector.broadcast %cst_109 : f32 to vector<2x64xf32>
      %247 = arith.maximumf %245, %246 : vector<2x64xf32>
      %248 = arith.truncf %247 : vector<2x64xf32> to vector<2x64xbf16>
      %c0_110 = arith.constant 0 : index
      %c0_111 = arith.constant 0 : index
      %249 = vector.load %arg32[%c0_110, %c0_111] : memref<64x1xbf16, #tpu.memory_space<vmem>>, vector<64x1xbf16>
      %cst_112 = arith.constant dense<0.000000e+00> : vector<2x1xf32>
      %250 = tpu.matmul %248, %249, %cst_112 {dimension_numbers = #tpu.dot_dimension_numbers<[1], [0], [0], [1], [0, 0, 1, 1], [], []>} : vector<2x64xbf16>, vector<64x1xbf16>, vector<2x1xf32> -> vector<2x1xf32>
      %c0_113 = arith.constant 0 : index
      %c0_114 = arith.constant 0 : index
      %251 = vector.load %arg33[%c0_113, %c0_114] : memref<1x1xf32, #tpu.memory_space<vmem>>, vector<1x1xf32>
      %252 = vector.broadcast %251 : vector<1x1xf32> to vector<2x1xf32>
      %253 = arith.addf %250, %252 : vector<2x1xf32>
      %cst_115 = arith.constant 0.000000e+00 : f32
      %254 = vector.broadcast %cst_115 : f32 to vector<2x1xf32>
      %255 = arith.subf %254, %253 : vector<2x1xf32>
      %256 = math.exp %255 : vector<2x1xf32>
      %cst_116 = arith.constant 1.000000e+00 : f32
      %257 = vector.broadcast %cst_116 : f32 to vector<2x1xf32>
      %258 = arith.addf %257, %256 : vector<2x1xf32>
      %cst_117 = arith.constant 1.000000e+00 : f32
      %259 = vector.broadcast %cst_117 : f32 to vector<2x1xf32>
      %260 = arith.divf %259, %258 : vector<2x1xf32>
      %c0_118 = arith.constant 0 : index
      %c0_119 = arith.constant 0 : index
      %261 = vector.load %arg34[%c0_118, %c0_119] : memref<2x1xf32, #tpu.memory_space<vmem>>, vector<2x1xf32>
      tpu.vector_store %arg34[%c0_118, %c0_119], %260 {strides = array<i32>} : memref<2x1xf32, #tpu.memory_space<vmem>>, vector<2x1xf32>,
    } else {
    }
    return
  }
  func.func @transform_0(%arg0: i32) -> (i32, i32, i32) {
    %c0_i32 = arith.constant 0 : i32
    %c0_i32_0 = arith.constant 0 : i32
    %c0_i32_1 = arith.constant 0 : i32
    %c0_i32_2 = arith.constant 0 : i32
    return %c0_i32, %c0_i32_0, %c0_i32_1 : i32, i32, i32
  }
  func.func @transform_1(%arg0: i32) -> (i32, i32) {
    %c0_i32 = arith.constant 0 : i32
    %c0_i32_0 = arith.constant 0 : i32
    %c0_i32_1 = arith.constant 0 : i32
    return %c0_i32, %c0_i32_0 : i32, i32
  }
  func.func @transform_2(%arg0: i32) -> (i32, i32) {
    %c0_i32 = arith.constant 0 : i32
    %c0_i32_0 = arith.constant 0 : i32
    %c0_i32_1 = arith.constant 0 : i32
    return %c0_i32, %c0_i32_0 : i32, i32
  }
  func.func @transform_3(%arg0: i32) -> (i32, i32) {
    %c0_i32 = arith.constant 0 : i32
    %c0_i32_0 = arith.constant 0 : i32
    %c0_i32_1 = arith.constant 0 : i32
    return %c0_i32, %c0_i32_0 : i32, i32
  }
  func.func @transform_4(%arg0: i32) -> (i32, i32) {
    %c0_i32 = arith.constant 0 : i32
    %c0_i32_0 = arith.constant 0 : i32
    %c0_i32_1 = arith.constant 0 : i32
    return %c0_i32, %c0_i32_0 : i32, i32
  }
  func.func @transform_5(%arg0: i32) -> (i32, i32) {
    %c0_i32 = arith.constant 0 : i32
    %c0_i32_0 = arith.constant 0 : i32
    %c0_i32_1 = arith.constant 0 : i32
    return %c0_i32, %c0_i32_0 : i32, i32
  }
  func.func @transform_6(%arg0: i32) -> (i32, i32) {
    %c0_i32 = arith.constant 0 : i32
    %c0_i32_0 = arith.constant 0 : i32
    %c0_i32_1 = arith.constant 0 : i32
    return %c0_i32, %c0_i32_0 : i32, i32
  }
  func.func @transform_7(%arg0: i32) -> (i32, i32) {
    %c0_i32 = arith.constant 0 : i32
    %c0_i32_0 = arith.constant 0 : i32
    %c0_i32_1 = arith.constant 0 : i32
    return %c0_i32, %c0_i32_0 : i32, i32
  }
  func.func @transform_8(%arg0: i32) -> (i32, i32) {
    %c0_i32 = arith.constant 0 : i32
    %c0_i32_0 = arith.constant 0 : i32
    %c0_i32_1 = arith.constant 0 : i32
    return %c0_i32, %c0_i32_0 : i32, i32
  }
  func.func @transform_9(%arg0: i32) -> (i32, i32, i32) {
    %c0_i32 = arith.constant 0 : i32
    %c0_i32_0 = arith.constant 0 : i32
    %c0_i32_1 = arith.constant 0 : i32
    return %arg0, %c0_i32, %c0_i32_0 : i32, i32, i32
  }
  func.func @transform_10(%arg0: i32) -> (i32, i32, i32) {
    %c0_i32 = arith.constant 0 : i32
    %c0_i32_0 = arith.constant 0 : i32
    %c0_i32_1 = arith.constant 0 : i32
    return %arg0, %c0_i32, %c0_i32_0 : i32, i32, i32
  }
  func.func @transform_11(%arg0: i32) -> (i32, i32, i32) {
    %c0_i32 = arith.constant 0 : i32
    %c0_i32_0 = arith.constant 0 : i32
    %c0_i32_1 = arith.constant 0 : i32
    return %arg0, %c0_i32, %c0_i32_0 : i32, i32, i32
  }
  func.func @transform_12(%arg0: i32) -> (i32, i32, i32) {
    %c0_i32 = arith.constant 0 : i32
    %c0_i32_0 = arith.constant 0 : i32
    %c0_i32_1 = arith.constant 0 : i32
    return %arg0, %c0_i32, %c0_i32_0 : i32, i32, i32
  }
  func.func @transform_13(%arg0: i32) -> (i32, i32, i32) {
    %c0_i32 = arith.constant 0 : i32
    %c0_i32_0 = arith.constant 0 : i32
    %c0_i32_1 = arith.constant 0 : i32
    return %arg0, %c0_i32, %c0_i32_0 : i32, i32, i32
  }
  func.func @transform_14(%arg0: i32) -> (i32, i32, i32) {
    %c0_i32 = arith.constant 0 : i32
    %c0_i32_0 = arith.constant 0 : i32
    %c0_i32_1 = arith.constant 0 : i32
    return %arg0, %c0_i32, %c0_i32_0 : i32, i32, i32
  }
  func.func @transform_15(%arg0: i32) -> (i32, i32, i32) {
    %c0_i32 = arith.constant 0 : i32
    %c0_i32_0 = arith.constant 0 : i32
    %c0_i32_1 = arith.constant 0 : i32
    return %arg0, %c0_i32, %c0_i32_0 : i32, i32, i32
  }
  func.func @transform_16(%arg0: i32) -> (i32, i32, i32) {
    %c0_i32 = arith.constant 0 : i32
    %c0_i32_0 = arith.constant 0 : i32
    %c0_i32_1 = arith.constant 0 : i32
    return %arg0, %c0_i32, %c0_i32_0 : i32, i32, i32
  }
  func.func @transform_17(%arg0: i32) -> (i32, i32, i32) {
    %c0_i32 = arith.constant 0 : i32
    %c0_i32_0 = arith.constant 0 : i32
    %c0_i32_1 = arith.constant 0 : i32
    return %arg0, %c0_i32, %c0_i32_0 : i32, i32, i32
  }
  func.func @transform_18(%arg0: i32) -> (i32, i32, i32) {
    %c0_i32 = arith.constant 0 : i32
    %c0_i32_0 = arith.constant 0 : i32
    %c0_i32_1 = arith.constant 0 : i32
    return %arg0, %c0_i32, %c0_i32_0 : i32, i32, i32
  }
  func.func @transform_19(%arg0: i32) -> (i32, i32, i32) {
    %c0_i32 = arith.constant 0 : i32
    %c0_i32_0 = arith.constant 0 : i32
    %c0_i32_1 = arith.constant 0 : i32
    return %arg0, %c0_i32, %c0_i32_0 : i32, i32, i32
  }
  func.func @transform_20(%arg0: i32) -> (i32, i32, i32) {
    %c0_i32 = arith.constant 0 : i32
    %c0_i32_0 = arith.constant 0 : i32
    %c0_i32_1 = arith.constant 0 : i32
    return %arg0, %c0_i32, %c0_i32_0 : i32, i32, i32
  }
  func.func @transform_21(%arg0: i32) -> (i32, i32, i32) {
    %c0_i32 = arith.constant 0 : i32
    %c0_i32_0 = arith.constant 0 : i32
    %c0_i32_1 = arith.constant 0 : i32
    return %arg0, %c0_i32, %c0_i32_0 : i32, i32, i32
  }
  func.func @transform_22(%arg0: i32) -> (i32, i32, i32) {
    %c0_i32 = arith.constant 0 : i32
    %c0_i32_0 = arith.constant 0 : i32
    %c0_i32_1 = arith.constant 0 : i32
    return %arg0, %c0_i32, %c0_i32_0 : i32, i32, i32
  }
  func.func @transform_23(%arg0: i32) -> (i32, i32, i32) {
    %c0_i32 = arith.constant 0 : i32
    %c0_i32_0 = arith.constant 0 : i32
    %c0_i32_1 = arith.constant 0 : i32
    return %arg0, %c0_i32, %c0_i32_0 : i32, i32, i32
  }
  func.func @transform_24(%arg0: i32) -> (i32, i32, i32) {
    %c0_i32 = arith.constant 0 : i32
    %c0_i32_0 = arith.constant 0 : i32
    %c0_i32_1 = arith.constant 0 : i32
    return %arg0, %c0_i32, %c0_i32_0 : i32, i32, i32
  }
  func.func @transform_25(%arg0: i32) -> (i32, i32) {
    %c0_i32 = arith.constant 0 : i32
    %c0_i32_0 = arith.constant 0 : i32
    %c0_i32_1 = arith.constant 0 : i32
    return %c0_i32, %c0_i32_0 : i32, i32
  }
  func.func @transform_26(%arg0: i32) -> (i32, i32) {
    %c0_i32 = arith.constant 0 : i32
    %c0_i32_0 = arith.constant 0 : i32
    %c0_i32_1 = arith.constant 0 : i32
    return %c0_i32, %c0_i32_0 : i32, i32
  }
  func.func @transform_27(%arg0: i32) -> (i32, i32) {
    %c0_i32 = arith.constant 0 : i32
    %c0_i32_0 = arith.constant 0 : i32
    %c0_i32_1 = arith.constant 0 : i32
    return %c0_i32, %c0_i32_0 : i32, i32
  }
  func.func @transform_28(%arg0: i32) -> (i32, i32) {
    %c0_i32 = arith.constant 0 : i32
    %c0_i32_0 = arith.constant 0 : i32
    %c0_i32_1 = arith.constant 0 : i32
    return %c0_i32, %c0_i32_0 : i32, i32
  }
  func.func @transform_29(%arg0: i32) -> (i32, i32) {
    %c0_i32 = arith.constant 0 : i32
    %c0_i32_0 = arith.constant 0 : i32
    %c0_i32_1 = arith.constant 0 : i32
    return %c0_i32, %c0_i32_0 : i32, i32
  }
  func.func @transform_30(%arg0: i32) -> (i32, i32) {
    %c0_i32 = arith.constant 0 : i32
    %c0_i32_0 = arith.constant 0 : i32
    %c0_i32_1 = arith.constant 0 : i32
    return %c0_i32, %c0_i32_0 : i32, i32
  }
  func.func @transform_31(%arg0: i32) -> (i32, i32) {
    %c0_i32 = arith.constant 0 : i32
    %c0_i32_0 = arith.constant 0 : i32
    %c0_i32_1 = arith.constant 0 : i32
    return %c0_i32, %c0_i32_0 : i32, i32
  }
  func.func @transform_32(%arg0: i32) -> (i32, i32) {
    %c0_i32 = arith.constant 0 : i32
    %c0_i32_0 = arith.constant 0 : i32
    %c0_i32_1 = arith.constant 0 : i32
    return %c0_i32, %c0_i32_0 : i32, i32
  }
  func.func @transform_33(%arg0: i32) -> (i32, i32) {
    %c0_i32 = arith.constant 0 : i32
    %c0_i32_0 = arith.constant 0 : i32
    %c0_i32_1 = arith.constant 0 : i32
    return %c0_i32, %c0_i32_0 : i32, i32
  }
}

</mosaic_0001>

<bundles_post_ra>
// kernel: tpu_custom_call.1
= control target key start
LH: loop header
LB: loop body
LE: loop exit
PB: predicated region body
PF: predicated region fallthrough
CT: control target
= control target key end

     0   :  { %s4756_s6 = smov 1   ;;  %s4757_s10 = smov 2   ;;  %s5536_s0 = inlined_call_operand.smem [shape: u32[34], index: -1, kind: input, shape index: {}] }
   0x1   :  { %s4817_s5 = sld [smem:[%s5536_s0]]   ;;  %s4758_s14 = smov 3  }
   0x2   :  { %s4822_s9 = sld [smem:[%s5536_s0 + %s4756_s6]]   ;;  %s4759_s18 = smov 4  }
   0x3   :  { %s4827_s13 = sld [smem:[%s5536_s0 + %s4757_s10]]   ;;  %s4760_s22 = smov 5  }
   0x4   :  { %s4832_s17 = sld [smem:[%s5536_s0 + %s4758_s14]]   ;;  %s4761_s26 = smov 6  }
   0x5   :  { %s4837_s21 = sld [smem:[%s5536_s0 + %s4759_s18]]   ;;  %s4762_s30 = smov 7  }
   0x6   :  { %s4842_s25 = sld [smem:[%s5536_s0 + %s4760_s22]]   ;;  %s4763_s4 = smov 8  }
   0x7   :  { %5547 = sst [smem:[#allocation15_spill]] %s4817_s5  ;;  %s4764_s10 = smov 9  }
   0x8   :  { %5548 = sst [smem:[#allocation16_spill]] %s4822_s9  ;;  %s4765_s15 = smov 10  }
   0x9   :  { %5549 = sst [smem:[#allocation17_spill]] %s4827_s13  ;;  %s4766_s20 = smov 11  }
   0xa   :  { %5550 = sst [smem:[#allocation18_spill]] %s4832_s17  ;;  %s4768_s1 = smov 13  }
   0xb   :  { %5551 = sst [smem:[#allocation19_spill]] %s4837_s21  ;;  %s4769_s7 = smov 14  }
   0xc   :  { %5552 = sst [smem:[#allocation20_spill]] %s4842_s25  ;;  %s4771_s22 = smov 16  }
   0xd   :  { %s4847_s29 = sld [smem:[%s5536_s0 + %s4761_s26]]   ;;  %s4767_s26 = smov 12  }
   0xe   :  { %s4852_s3 = sld [smem:[%s5536_s0 + %s4762_s30]]   ;;  %s4772_s28 = smov 17  }
   0xf   :  { %s4857_s8 = sld [smem:[%s5536_s0 + %s4763_s4]]  }
  0x10   :  { %s4862_s14 = sld [smem:[%s5536_s0 + %s4764_s10]]  }
  0x11   :  { %s4867_s19 = sld [smem:[%s5536_s0 + %s4765_s15]]   ;;  %s4770_s15 = smov 15  }
  0x12   :  { %s4872_s24 = sld [smem:[%s5536_s0 + %s4766_s20]]  }
  0x13   :  { %5553 = sst [smem:[#allocation21_spill]] %s4847_s29 }
  0x14   :  { %5554 = sst [smem:[#allocation22_spill]] %s4852_s3 }
  0x15   :  { %5555 = sst [smem:[#allocation23_spill]] %s4857_s8 }
  0x16   :  { %5556 = sst [smem:[#allocation24_spill]] %s4862_s14 }
  0x17   :  { %5557 = sst [smem:[#allocation25_spill]] %s4867_s19 }
  0x18   :  { %s4877_s30 = sld [smem:[%s5536_s0 + %s4767_s26]]  }
  0x19   :  { %s4882_s6 = sld [smem:[%s5536_s0 + %s4768_s1]]   ;;  %s4788_s1 = smov 33  }
  0x1a   :  { %s4887_s12 = sld [smem:[%s5536_s0 + %s4769_s7]]   ;;  %s4773_s7 = smov 18  }
  0x1b   :  { %s4892_s20 = sld [smem:[%s5536_s0 + %s4770_s15]]   ;;  %s4774_s15 = smov 19  }
  0x1c   :  { %s4897_s27 = sld [smem:[%s5536_s0 + %s4771_s22]]   ;;  %s4775_s22 = smov 20  }
  0x1d   :  { %s4902_s4 = sld [smem:[%s5536_s0 + %s4772_s28]]   ;;  %s4776_s28 = smov 21  }
  0x1e   :  { %s4907_s8 = sld [smem:[%s5536_s0 + %s4773_s7]]   ;;  %s4777_s7 = smov 22  }
  0x1f   :  { %s4912_s21 = sld [smem:[%s5536_s0 + %s4774_s15]]   ;;  %s4778_s15 = smov 23  }
  0x20   :  { %s4917_s9 = sld [smem:[%s5536_s0 + %s4775_s22]]   ;;  %s4779_s22 = smov 24  }
  0x23   :  { %5558 = sst [smem:[#allocation26_spill]] %s4902_s4 }
  0x24   :  { %5559 = sst [smem:[#allocation27_spill]] %s4907_s8 }
  0x25   :  { %5560 = sst [smem:[#allocation28_spill]] %s4912_s21 }
  0x26   :  { %5561 = sst [smem:[#allocation29_spill]] %s4917_s9 }
  0x27   :  { %s4922_s4 = sld [smem:[%s5536_s0 + %s4776_s28]]   ;;  %s4780_s28 = smov 25  }
  0x28   :  { %s4927_s8 = sld [smem:[%s5536_s0 + %s4777_s7]]   ;;  %s4781_s7 = smov 26  }
  0x29   :  { %s4932_s21 = sld [smem:[%s5536_s0 + %s4778_s15]]   ;;  %s4782_s15 = smov 27  }
  0x2a   :  { %s4937_s9 = sld [smem:[%s5536_s0 + %s4779_s22]]   ;;  %s4783_s22 = smov 28  }
  0x2d   :  { %5562 = sst [smem:[#allocation30_spill]] %s4922_s4 }
  0x2e   :  { %5563 = sst [smem:[#allocation31_spill]] %s4927_s8 }
  0x2f   :  { %5564 = sst [smem:[#allocation32_spill]] %s4932_s21 }
  0x30   :  { %5565 = sst [smem:[#allocation33_spill]] %s4937_s9 }
  0x31   :  { %s4942_s4 = sld [smem:[%s5536_s0 + %s4780_s28]]   ;;  %s4784_s28 = smov 29  }
  0x32   :  { %s4947_s8 = sld [smem:[%s5536_s0 + %s4781_s7]]   ;;  %s4785_s7 = smov 30  }
  0x33   :  { %s4952_s21 = sld [smem:[%s5536_s0 + %s4782_s15]]   ;;  %s4786_s15 = smov 31  }
  0x34   :  { %s4957_s9 = sld [smem:[%s5536_s0 + %s4783_s22]]   ;;  %s4787_s22 = smov 32  }
  0x37   :  { %5566 = sst [smem:[#allocation34_spill]] %s4942_s4 }
  0x38   :  { %5567 = sst [smem:[#allocation35_spill]] %s4947_s8 }
  0x39   :  { %5568 = sst [smem:[#allocation36_spill]] %s4952_s21 }
  0x3a   :  { %5569 = sst [smem:[#allocation37_spill]] %s4957_s9 }
  0x3b   :  { %s4962_s4 = sld [smem:[%s5536_s0 + %s4784_s28]]  }
  0x3c   :  { %s4967_s8 = sld [smem:[%s5536_s0 + %s4785_s7]]  }
  0x3d   :  { %s4972_s21 = sld [smem:[%s5536_s0 + %s4786_s15]]  }
  0x3e   :  { %s3917_s9 = sld [smem:[%s5536_s0 + %s4787_s22]]  }
  0x41   :  { %5570 = sst [smem:[#allocation38_spill]] %s4962_s4 }
  0x42   :  { %5571 = sst [smem:[#allocation39_spill]] %s4967_s8 }
  0x43   :  { %5572 = sst [smem:[#allocation40_spill]] %s4972_s21 }
  0x44   :  { %s4980_s4 = sld [smem:[%s5536_s0 + %s4788_s1]]   ;;  %v72_v0 = vstv %s3917_s9 }
  0x45   :  { %73 = vst [vmem:[#allocation3] sm:$0x1] %v72_v0 }
  0x4a   :  { %5573 = sst [smem:[#allocation41_spill]] %s4980_s4 }
  0x4b   :  { %74 = vsyncpa [#allocation5], 0 }
  0x4c   :  { %75 = vsyncpa [#allocation7], 0 }
  0x4d   :  { %76 = vsyncpa [#allocation10], 0  ;;  %s4982_s7 = smov 0  }
  0x4e LB: > { %s5574_s5 = sld [smem:[#allocation15_spill]]  ;;  %s4789_s10 = smov [#allocation6]   ;;  %s4754_s7 = sphi %s4982_s7, %s82_s7  }
  0x4f   : > { %5575 = sst [smem:[#allocation42_spill]] %s4754_s7  ;;  %s913_s11 = sshll.u32 %s4789_s10, 4  ;;  %s914_s11 = int_to_ptr.vmem [resolvable:$true] %s913_s11 }
  0x50   : > { %s4988_s15 = sadd.s32 4294967295, %s4754_s7   ;;  %p3920_p0 = scmp.ge.s32.totalorder %s4754_s7, 1 }
  0x51   : > { %5576 = sst [smem:[#allocation43_spill]] %s4988_s15  ;;  %p881_p1 = scmp.lt.s32.totalorder %s4754_s7, 3 }
  0x52   : > { %p5541_p3 = scmp.eq.s32.totalorder %s4988_s15, 0  ;;  %s4790_s9 = smov [#allocation9]  }
  0x53   : > { %p4994_p4 = pnand %p3920_p0, %p881_p1  ;;  %s938_s16 = sshll.u32 %s4790_s9, 4  ;;  %s5000_s16 = int_to_ptr.vmem [resolvable:$true] %s938_s16 }
  0x54   : > { %s4791_s18 = smov [#allocation4]   ;;  %s4792_s26 = smov [#allocation8]  }
  0x55   : > { %p4348_p5 = pneg %p4994_p4  ;;  %s899_s22 = sshll.u32 %s4791_s18, 4  ;;  %s5008_s22 = int_to_ptr.vmem [resolvable:$true] %s899_s22 }
  0x56   : > { %s5010_s1 = sshll.u32 %s4792_s26, 4  ;;  %s4617_s2 = scalar_lea.vmem %s914_s11, 16  ;;  %s928_s1 = int_to_ptr.vmem [resolvable:$true] %s5010_s1 }
  0x57   : > { %p5004_p6 = pnand %p5541_p3, %p4348_p5  ;;  %p4618_p8 = scmp.ne.s32.totalorder %s914_s11, %s4617_s2 }
  0x58   : > { %s4624_s10 = scalar_lea.vmem %s914_s11, 32  ;;  %p4625_p11 = scmp.lt.s32.totalorder %s914_s11, %s914_s11 }
  0x59   : > { %p5014_p7 = pneg %p5004_p6  ;;  %p4626_p12 = scmp.lt.s32.totalorder %s4624_s10, %s4617_s2 }
  0x5b   : > { %p4620_p9 = pnand %p4618_p8, %p5014_p7  ;;  %p4627_p13 = por %p4626_p12, %p4625_p11 }
  0x5d   : > { %p4621_p10 = pneg %p4620_p9 }
  0x5f   : > { %p4628_p0 = pnand %p4627_p13, %p4621_p10 }
  0x61   : > { %4631 = shalt.err (!%p4628_p0)
}
  0x62   : > { %s5580_s17 = sld [smem:[#allocation18_spill]]  ;;  %s4643_s9 = scalar_lea.vmem %s5000_s16, 16 }
  0x63   : > { %p4644_p1 = scmp.ne.s32.totalorder %s5000_s16, %s4643_s9  ;;  %s4650_s18 = scalar_lea.vmem %s5000_s16, 32 }
  0x64   : > { %p4651_p9 = scmp.lt.s32.totalorder %s5000_s16, %s5000_s16  ;;  %p4652_p11 = scmp.lt.s32.totalorder %s4650_s18, %s4643_s9 }
  0x65   : > { %p4646_p5 = pnand %p4644_p1, %p5014_p7 }
  0x66   : > { %p4653_p10 = por %p4652_p11, %p4651_p9 }
  0x67   : > { %p4647_p8 = pneg %p4646_p5 }
  0x68   : > { %4354 = dma.hbm_to_vmem [thread:$0]  (!%p5004_p6), %s5580_s17, 16, %s914_s11, [#allocation7]  }
  0x69   : > { %p4654_p12 = pnand %p4653_p10, %p4647_p8 }
  0x6b   : > { %4657 = shalt.err (!%p4654_p12)
}
  0x6c   : > { %s5581_s29 = sld [smem:[#allocation21_spill]]  ;;  %s4669_s11 = scalar_lea.vmem %s5008_s22, 192 }
  0x6d   : > { %p4670_p13 = scmp.ne.s32.totalorder %s5008_s22, %s4669_s11  ;;  %p4677_p5 = scmp.lt.s32.totalorder %s5008_s22, %s5008_s22 }
  0x6e   : > { %p4678_p2 = scmp.lt.s32.totalorder %s4669_s11, %s4669_s11 }
  0x6f   : > { %p4672_p0 = pnand %p4670_p13, %p5014_p7 }
  0x70   : > { %p4679_p9 = por %p4678_p2, %p4677_p5 }
  0x71   : > { %p4673_p1 = pneg %p4672_p0 }
  0x72   : > { %4360 = dma.hbm_to_vmem [thread:$0]  (!%p5004_p6), %s5581_s29, 16, %s5000_s16, [#allocation10]  }
  0x73   : > { %p4680_p8 = pnand %p4679_p9, %p4673_p1 }
  0x75   : > { %4683 = shalt.err (!%p4680_p8)
}
  0x76   : > { %s4793_s26 = smov 64   ;;  %s5582_s13 = sld [smem:[#allocation17_spill]] }
  0x77   : > { %s4794_s2 = smov 4   ;;  %s4695_s16 = scalar_lea.vmem %s928_s1, 16 }
  0x78   : > { %p4696_p11 = scmp.ne.s32.totalorder %s928_s1, %s4695_s16  ;;  %s4702_s10 = scalar_lea.vmem %s928_s1, 32 }
  0x79   : > { %p4703_p13 = scmp.lt.s32.totalorder %s928_s1, %s928_s1  ;;  %p4704_p2 = scmp.lt.s32.totalorder %s4702_s10, %s4695_s16 }
  0x7a   : > { %p4698_p10 = pnand %p4696_p11, %p5014_p7 }
  0x7b   : > { %p4705_p0 = por %p4704_p2, %p4703_p13 }
  0x7c   : > { %4351 = dma.hbm_to_vmem [thread:$0]  (!%p5004_p6), %s5582_s13, 192, %s5008_s22, [#allocation5], %s4793_s26, %s4793_s26, %s4794_s2  }
  0x7d   : > { %p4699_p12 = pneg %p4698_p10 }
  0x7f   : > { %p4706_p1 = pnand %p4705_p0, %p4699_p12 }
  0x81   : > { %4709 = shalt.err (!%p4706_p1)
}
  0x82   : > { %s5583_s25 = sld [smem:[#allocation20_spill]]  ;;  %s4795_s9 = smov [#allocation11]  }
  0x83   : > { %s949_s18 = sshll.u32 %s4795_s9, 4  ;;  %s950_s18 = int_to_ptr.vmem [resolvable:$true] %s949_s18 }
  0x84   : > { %s4721_s22 = scalar_lea.vmem %s950_s18, 16  ;;  %s4728_s11 = scalar_lea.vmem %s950_s18, 32 }
  0x85   : > { %p4722_p5 = scmp.ne.s32.totalorder %s950_s18, %s4721_s22  ;;  %p4729_p11 = scmp.lt.s32.totalorder %s950_s18, %s950_s18 }
  0x86   : > { %p4730_p10 = scmp.lt.s32.totalorder %s4728_s11, %s4721_s22 }
  0x87   : > { %p4724_p9 = pnand %p4722_p5, %p5014_p7 }
  0x88   : > { %4357 = dma.hbm_to_vmem [thread:$0]  (!%p5004_p6), %s5583_s25, 16, %s928_s1, [#allocation7]  }
  0x89   : > { %p4725_p8 = pneg %p4724_p9  ;;  %p4731_p3 = por %p4730_p10, %p4729_p11 }
  0x8b   : > { %p4732_p13 = pnand %p4731_p3, %p4725_p8 }
  0x8d   : > { %4735 = shalt.err (!%p4732_p13)
}
  0x8e   : > { %s5584_s3 = sld [smem:[#allocation22_spill]] }
  0x90   : > { %1097 = sbr.rel (%p4994_p4) target bundleno = 5586 (0x15d2), region = 152 }
  0x94   : > { %4363 = dma.hbm_to_vmem [thread:$0]  (!%p5004_p6), %s5584_s3, 16, %s950_s18, [#allocation10]  }
  0x95   : > { %p5585_p12 = scmp.eq.s32.totalorder %s4988_s15, 0 }
  0x97   : > { %4741 = dma.done.wait (%p5585_p12), [#allocation5], 192   ;;  %p5586_p2 = pmov %p5585_p12 }
  0x99   : > { %4743 = vsyncadd (%p5586_p2), [#allocation5], 4294967104  ;;  %p5587_p7 = pmov %p5586_p2 }
  0x9a   : > { %p5588_p0 = pmov %p5586_p2 }
  0x9b   : > { %4745 = dma.done.wait (%p5587_p7), [#allocation7], 32  }
  0x9c   : > { %4747 = vsyncadd (%p5588_p0), [#allocation7], 4294967264  ;;  %p5589_p3 = pmov %p5588_p0 }
  0x9d   : > { %p5590_p6 = pmov %p5588_p0 }
  0x9e   : > { %4749 = dma.done.wait (%p5589_p3), [#allocation10], 32  }
  0x9f   : > { %4751 = vsyncadd (%p5590_p6), [#allocation10], 4294967264  ;;  %v1310_v1 = vlaneseq  ;;  %v4796_v2 = vmov 0   ;;  %p1247_p4 = scmp.lt.s32.totalorder %s4988_s15, 1  ;;  %v1308_v6 = vld [vmem:[%s5574_s5] sm:$0x1] }
  0xa0   : > { %4435 = vset.pattern.permute.xlu0 %v4796_v2  ;;  %v1309_v7 = vld [vmem:[%s5574_s5 + $0x1] sm:$0x1]  ;;  %s5591_s14 = sld [smem:[#allocation24_spill]]  ;;  %v4797_v10 = vmov 0.0   ;;  %v4798_v18 = vmov -1e+09  }
  0xa1   : > { %v5070_v3 = vshrl.u32 %v1310_v1, 7  ;;  %1316 = vperm.xlu0 %4435, %v1308_v6   ;;  %s5082_s0 = scalar_select %p1247_p4, %s4988_s15, 1  ;;  %v5138_v15 = vand.u32 127, %v1310_v1 }
  0xa2   : > { %s5593_s1 = sld [smem:[#allocation26_spill]] }
  0xa3   : > { %v1314_v4 = vadd.s32 8, %v5070_v3  ;;  %v5074_v5 = vsub.s32 0, %v5070_v3  ;;  %s4036_s23 = sshll.u32 %s5082_s0, 4  ;;  %s4041_s28 = sshll.u32 %s5082_s0, 6 }
  0xa4   : > { %s5594_s26 = sld [smem:[#allocation27_spill]]  ;;  %s5106_s5 = scalar_lea.vmem %s4872_s24, %s4036_s23 }
  0xa5   : > { %v1336_v8 = vrot.slane %v1308_v6, %v5074_v5  ;;  %v1340_v9 = vrot.slane %v1309_v7, %v5074_v5  ;;  %s5595_s2 = sld [smem:[#allocation28_spill]]  ;;  %1323 = vperm.xlu0 %4435, %v1309_v7   ;;  %s1262_s13 = scalar_lea.vmem %s4877_s30, %s5082_s0 }
  0xa6   : > { %s5596_s16 = sld [smem:[#allocation29_spill]]  ;;  %s5101_s22 = scalar_lea.vmem %s5591_s14, %s4036_s23 }
  0xa7   : > { %vm1341_vm0 = vcmp.lt.s32.totalorder %v5070_v3, %v1336_v8  ;;  %vm1342_vm1 = vcmp.lt.s32.totalorder %v1314_v4, %v1336_v8  ;;  %vm1343_vm2 = vcmp.lt.s32.totalorder %v5070_v3, %v1340_v9  ;;  %vm1344_vm3 = vcmp.lt.s32.totalorder %v1314_v4, %v1340_v9  ;;  %s5597_s10 = sld [smem:[#allocation30_spill]]  ;;  %s5111_s17 = scalar_lea.vmem %s4882_s6, %s4036_s23 }
  0xa8   : > { %v5089_v11 = vsel %vm1341_vm0, 1.0, %v4797_v10  ;;  %v5092_v12 = vsel %vm1342_vm1, 1.0, %v4797_v10  ;;  %v5095_v13 = vsel %vm1343_vm2, 1.0, %v4797_v10  ;;  %s5598_s9 = sld [smem:[#allocation31_spill]]  ;;  %v5098_v14 = vsel %vm1344_vm3, 1.0, %v4797_v10  ;;  %s1270_s25 = scalar_lea.vmem %s4887_s12, %s5082_s0 }
  0xa9   : > { %s5599_s18 = sld [smem:[#allocation32_spill]]  ;;  %s5116_s29 = scalar_lea.vmem %s4892_s20, %s4036_s23 }
  0xaa   : > { %5600 = sst [smem:[#allocation44_spill]] %s5101_s22  ;;  %s1278_s7 = scalar_lea.vmem %s4897_s27, %s5082_s0 }
  0xab   : > { %s5601_s11 = sld [smem:[#allocation33_spill]]  ;;  %s1281_s4 = scalar_lea.vmem %s5593_s1, %s5082_s0 }
  0xac   : > { %s1284_s8 = scalar_lea.vmem %s5594_s26, %s5082_s0  ;;  %s5125_s21 = scalar_lea.vmem %s5595_s2, %s4036_s23 }
  0xad   : > { %s1292_s15 = scalar_lea.vmem %s5596_s16, %s5082_s0  ;;  %s5130_s14 = scalar_lea.vmem %s5597_s10, %s4041_s28 }
  0xae   : > { %s1300_s22 = scalar_lea.vmem %s5598_s9, %s5082_s0  ;;  %s5602_s23 = sld [smem:[#allocation43_spill]] }
  0xaf   : > { %s1303_s3 = scalar_lea.vmem %s5599_s18, %s5082_s0 }
  0xb1   : > { %s1306_s19 = scalar_lea.vmem %s5601_s11, %s5082_s0 }
  0xb4   : > { %p5603_p1 = scmp.ne.s32.totalorder %s5602_s23, 0 }
  0xb5   : > { %s5604_s1 = sld [smem:[#allocation16_spill]] (!%p5603_p1) }
  0xb6   : > { %s5605_s28 = sld [smem:[#allocation19_spill]] (!%p5603_p1) }
  0xb7   : > { %s5606_s26 = sld [smem:[#allocation23_spill]] (!%p5603_p1) }
 0x11c   : > { %v1317_v16 = vpop.permute.xlu0 %1316 }
 0x11d   : > { %v1321_v17 = vrot.slane %v1317_v16, %v5074_v5 }
 0x11f   : > { %vm1329_vm4 = vcmp.lt.s32.totalorder %v5138_v15, %v1321_v17 }
 0x120   : > { %v5142_v19 = vsel %vm1329_vm4, 0.0, %v4798_v18  ;;  %v1324_v20 = vpop.permute.xlu0 %1323  ;;  %1356 = sbr.rel (%p5603_p1) target bundleno = 1025 (0x401), region = 176 }
 0x121   : > { %v1328_v21 = vrot.slane %v1324_v20, %v5074_v5 }
 0x123   : > { %vm1330_vm5 = vcmp.lt.s32.totalorder %v5138_v15, %v1328_v21 }
 0x124   : > { %v5146_v22 = vsel %vm1330_vm5, 0.0, %v4798_v18 }
 0x125   : > { %v4436_v23 = vld [vmem:[#allocation4 + $0x8] ss:$0 sps:$4 sm:$0x11]   ;;  %vm1397_vm6 = vcmask 1040384   ;;  %v4799_v24 = vmov 0   ;;  %v4438_v26 = vld [vmem:[%s5604_s1] sm:$0xff]  }
 0x126   : > { %v1399_v25 = vsel %vm1397_vm6, 65535, %v4799_v24  ;;  %v4437_v28 = vld [vmem:[#allocation4] sm:$0xff]   ;;  %vm1390_vm7 = vcmask 138240   ;;  %v3950_v35 = vld [vmem:[#allocation6] ss:$0 sm:$0xff]  ;;  %vm1477_vm8 = vcmask 261120  }
 0x127   : > { %v1401_v27 = vand.u32 %v4436_v23, %v1399_v25  ;;  %4129 = vmatprep.mubr.msk.bf16.mxu0 %vm1390_vm7, %v4438_v26  ;;  %v4439_v29 = vld [vmem:[%s5604_s1 + $0x8] sm:$0xff]   ;;  %v4441_v31 = vld [vmem:[%s5605_s28] sm:$0xff]  }
 0x128   : > { %v4440_v30 = vld [vmem:[%s5605_s28 + $0x8] sm:$0xff]  }
 0x129   : > { %4125 = vmatprep.subr.bf16.mxu0 %v1401_v27  ;;  %4133 = vmatprep.subr.bf16.mxu1 %v4440_v30  ;;  %v3957_v43 = vld [vmem:[#allocation8] ss:$0 sm:$0xff] }
 0x12a   : > { %4126 = vmatpush3.bf16.msra.mxu0 %v1401_v27  ;;  %4134 = vmatpush3.bf16.msra.mxu1 %v4440_v30 }
 0x12b   : > { %4127 = vmatprep.subr.bf16.mxu0 %v4437_v28  ;;  %4135 = vmatprep.subr.bf16.mxu1 %v4441_v31 }
 0x12e   : > { %4128 = vmatpush3.bf16.msra.mxu0 %v4437_v28  ;;  %4136 = vmatpush3.bf16.msra.mxu1 %v4441_v31 }
 0x131   : > { %4130 = vmatmul.mubr.msk.bf16.vlgmr.msra.gmra.mxu0 %vm1390_vm7, %v4439_v29 }
 0x1f1   : > { %v4131_v32 = vpop.f32.mrf.mxu0 }
 0x1f2   : > { %v1446_v40 = vadd.f32 %v4131_v32, %v3950_v35 }
 0x1f3   : > { %v1437_v33 = vpop.f32.mrf.mxu0 }
 0x1f4   : > { %v1438_v38 = vadd.f32 %v3950_v35, %v1437_v33 }
 0x1f5   : > { %v4132_v34 = vpop.f32.mrf.mxu0 }
 0x1f6   : > { %v1449_v36 = vadd.f32 %v4132_v34, %v3950_v35 }
 0x1f7   : > { %v1440_v37 = vpop.f32.mrf.mxu0 }
 0x1f8   : > { %v1441_v39 = vadd.f32 %v3950_v35, %v1440_v37  ;;  %v1453_v42 = vpack.c.bf16 %v1449_v36, %v1446_v40  ;;  %v3962_v36 = vld [vmem:[#allocation9] ss:$0 sm:$0xff] }
 0x1fa   : > { %v1452_v41 = vpack.c.bf16 %v1441_v39, %v1438_v38  ;;  %v3963_v38 = vld [vmem:[#allocation11] ss:$0 sm:$0xff] }
 0x1fc   : > { %4137 = vmatprep.mubr.msk.bf16.mxu1 %vm1477_vm8, %v1452_v41  ;;  %v1608_v41 = vld [vmem:[%s5606_s26] sm:$0xff] }
 0x1fd   : > { %4138 = vmatmul.mubr.msk.bf16.vlgmr.msra.gmra.mxu1 %vm1477_vm8, %v1453_v42 }
 0x2bd   : > { %v4139_v44 = vpop.f32.mrf.mxu1 }
 0x2be   : > { %v1527_v45 = vadd.f32 %v4139_v44, %v3957_v43 }
 0x2bf   : > { %v1518_v46 = vpop.f32.mrf.mxu1 }
 0x2c0   : > { %v1519_v47 = vadd.f32 %v3957_v43, %v1518_v46  ;;  %v1541_v48 = vsel %vm1477_vm8, %v1527_v45, 0.0 }
 0x2c1   : > { %1542 = vadd.xlane.f32.xlu1 %v1541_v48  ;;  %v4140_v49 = vpop.f32.mrf.mxu1 }
 0x2c2   : > { %v1530_v50 = vadd.f32 %v4140_v49, %v3957_v43  ;;  %v1535_v51 = vsel %vm1477_vm8, %v1519_v47, 0.0  ;;  %v1609_v49 = vld [vmem:[%s5606_s26 + $0x8] sm:$0xff] }
 0x2c3   : > { %v1521_v52 = vpop.f32.mrf.mxu1  ;;  %1536 = vadd.xlane.f32.xlu0 %v1535_v51 }
 0x2c4   : > { %v1522_v53 = vadd.f32 %v3957_v43, %v1521_v52  ;;  %v1544_v54 = vsel %vm1477_vm8, %v1530_v50, 0.0 }
 0x2c5   : > { %1545 = vadd.xlane.f32.xlu1 %v1544_v54 }
 0x2c6   : > { %v1538_v55 = vsel %vm1477_vm8, %v1522_v53, 0.0 }
 0x2c7   : > { %1539 = vadd.xlane.f32.xlu0 %v1538_v55 }
 0x34a   : > { %v1543_v56 = vpop.xlane.xlu1 %1542 }
 0x34b   : > { %v1550_v57 = vmul.f32 0.03125, %v1543_v56 }
 0x34c   : > { %v1537_v58 = vpop.xlane.xlu0 %1536 }
 0x34d   : > { %v1548_v59 = vmul.f32 0.03125, %v1537_v58  ;;  %v1554_v61 = vsub.f32 %v1527_v45, %v1550_v57 }
 0x34e   : > { %v1546_v60 = vpop.xlane.xlu1 %1545 }
 0x34f   : > { %v1552_v62 = vsub.f32 %v1519_v47, %v1548_v59  ;;  %v1551_v63 = vmul.f32 0.03125, %v1546_v60  ;;  %v1558_v9 = vmul.f32 %v1554_v61, %v1554_v61 }
 0x350   : > { %v1540_v0 = vpop.xlane.xlu0 %1539 }
 0x351   : > { %v1549_v1 = vmul.f32 0.03125, %v1540_v0  ;;  %v1556_v4 = vmul.f32 %v1552_v62, %v1552_v62  ;;  %v1555_v6 = vsub.f32 %v1530_v50, %v1551_v63  ;;  %v1566_v17 = vsel %vm1477_vm8, %v1558_v9, 0.0 }
 0x353   : > { %v1553_v7 = vsub.f32 %v1522_v53, %v1549_v1  ;;  %v1560_v8 = vsel %vm1477_vm8, %v1556_v4, 0.0  ;;  %v1559_v20 = vmul.f32 %v1555_v6, %v1555_v6 }
 0x354   : > { %1561 = vadd.xlane.f32.xlu0 %v1560_v8 }
 0x355   : > { %v1557_v16 = vmul.f32 %v1553_v7, %v1553_v7  ;;  %v1569_v21 = vsel %vm1477_vm8, %v1559_v20, 0.0 }
 0x357   : > { %v1563_v18 = vsel %vm1477_vm8, %v1557_v16, 0.0 }
 0x358   : > { %1567 = vadd.xlane.f32.xlu0 %v1566_v17  ;;  %1564 = vadd.xlane.f32.xlu1 %v1563_v18 }
 0x35c   : > { %1570 = vadd.xlane.f32.xlu1 %v1569_v21 }
 0x3dd   : > { %v1562_v23 = vpop.xlane.xlu0 %1561 }
 0x3de   : > { %v1572_v24 = vmul.f32 0.03125, %v1562_v23 }
 0x3e0   : > { %v1576_v25 = vadd.f32 1e-05, %v1572_v24 }
 0x3e1   : > { %v1565_v26 = vpop.xlane.xlu1 %1564  ;;  %v1568_v27 = vpop.xlane.xlu0 %1567 }
 0x3e2   : > { %4442 = vrsqrt.f32 %v1576_v25  ;;  %v1573_v28 = vmul.f32 0.03125, %v1565_v26  ;;  %v1574_v29 = vmul.f32 0.03125, %v1568_v27 }
 0x3e4   : > { %v1577_v30 = vadd.f32 1e-05, %v1573_v28  ;;  %v1578_v31 = vadd.f32 1e-05, %v1574_v29 }
 0x3e5   : > { %v1571_v32 = vpop.xlane.xlu1 %1570 }
 0x3e6   : > { %4444 = vrsqrt.f32 %v1577_v30  ;;  %v1575_v33 = vmul.f32 0.03125, %v1571_v32 }
 0x3e7   : > { %4446 = vrsqrt.f32 %v1578_v31 }
 0x3e8   : > { %v1579_v34 = vadd.f32 1e-05, %v1575_v33 }
 0x3ea   : > { %4448 = vrsqrt.f32 %v1579_v34 }
 0x3ef   : > { %v4443_v35 = vpop.eup %4442 }
 0x3f0   : > { %v1584_v37 = vmul.f32 %v4443_v35, %v1552_v62 }
 0x3f2   : > { %v1594_v39 = vmul.f32 %v3962_v36, %v1584_v37 }
 0x3f3   : > { %v4445_v40 = vpop.eup %4444 }
 0x3f4   : > { %v4447_v42 = vpop.eup %4446  ;;  %v1604_v43 = vadd.f32 %v3963_v38, %v1594_v39  ;;  %v1585_v44 = vmul.f32 %v4445_v40, %v1553_v7 }
 0x3f5   : > { %v1586_v45 = vmul.f32 %v4447_v42, %v1554_v61 }
 0x3f6   : > { %v1610_v46 = vadd.f32 %v1608_v41, %v1604_v43  ;;  %v1595_v47 = vmul.f32 %v3962_v36, %v1585_v44 }
 0x3f7   : > { %v4449_v48 = vpop.eup %4448  ;;  %v1596_v50 = vmul.f32 %v3962_v36, %v1586_v45 }
 0x3f8   : > { %1614 = vst.msk [vmem:[#allocation2] sm:$0xff] %vm1477_vm8, %v1610_v46  ;;  %v1605_v51 = vadd.f32 %v3963_v38, %v1595_v47  ;;  %v1587_v52 = vmul.f32 %v4449_v48, %v1555_v6 }
 0x3f9   : > { %v1606_v53 = vadd.f32 %v3963_v38, %v1596_v50 }
 0x3fa   : > { %v1611_v54 = vadd.f32 %v1609_v49, %v1605_v51  ;;  %v1597_v55 = vmul.f32 %v3962_v36, %v1587_v52 }
 0x3fb   : > { %v1612_v56 = vadd.f32 %v1608_v41, %v1606_v53 }
 0x3fc   : > { %1615 = vst.msk [vmem:[#allocation2 + $0x8] sm:$0xff] %vm1477_vm8, %v1611_v54  ;;  %v1607_v57 = vadd.f32 %v3963_v38, %v1597_v55 }
 0x3fd   : > { %1616 = vst.msk [vmem:[#allocation2 + $0x10] sm:$0xff] %vm1477_vm8, %v1612_v56 }
 0x3fe   : > { %v1613_v58 = vadd.f32 %v1609_v49, %v1607_v57 }
 0x400   : > { %1617 = vst.msk [vmem:[#allocation2 + $0x18] sm:$0xff] %vm1477_vm8, %v1613_v58 }
 0x401 PF: > { %s5607_s2 = sld [smem:[#allocation44_spill]]  ;;  %4165 = vmatprep.subr.bf16.mxu1 %v4797_v10  ;;  %4486 = vset.pattern.permute.xlu1 %v4796_v2  ;;  %v1618_v61 = vld [vmem:[#allocation2] sm:$0xff]  ;;  %vm1647_vm9 = vcmask 261120   ;;  %v4494_v4 = vld [vmem:[%s5106_s5 + $0x8] sm:$0xff]   ;;  %vm4800_vm10 = vmmov 0   ;;  %vm1853_vm11 = vcmask 64512  }
 0x402   : > { %4480 = vset.pattern.permute.xlu0 %v4796_v2  ;;  %v4495_v7 = vld [vmem:[%s5106_s5] sm:$0xff]   ;;  %v4496_v2 = vld [vmem:[%s5111_s17 + $0x8] sm:$0xff]   ;;  %4167 = vmatprep.mubr.msk.bf16.mxu1 %vm4800_vm10, %v4797_v10  ;;  %s5608_s5 = sld [smem:[#allocation25_spill]]  ;;  %vm1956_vm12 = vcmask 130048   ;;  %s4803_s16 = smov 104   ;;  %vm2903_vm13 = vcmask 195584  }
 0x403   : > { %v1619_v62 = vld [vmem:[#allocation2 + $0x8] sm:$0xff]  ;;  %v4497_v8 = vld [vmem:[%s5111_s17] sm:$0xff]   ;;  %s4804_s10 = smov 8   ;;  %s4805_s9 = smov 16  }
 0x404   : > { %v1620_v63 = vld [vmem:[#allocation2 + $0x10] sm:$0xff]  ;;  %v1622_v0 = vpack.c.bf16 %v1619_v62, %v1618_v61  ;;  %v3969_v21 = vld [vmem:[%s1262_s13] ss:$0 sm:$0xff]  ;;  %s4801_s13 = smov 120   ;;  %s4806_s18 = smov 24  }
 0x405   : > { %v3974_v42 = vld [vmem:[%s1270_s25] ss:$0 sm:$0xff]  ;;  %s4802_s25 = smov 112  }
 0x406   : > { %4145 = vmatprep.mubr.msk.bf16.mxu0 %vm1647_vm9, %v1622_v0 }
 0x407   : > { %v4492_v59 = vld [vmem:[%s5607_s2 + $0x8] sm:$0xff]   ;;  %v4493_v60 = vld [vmem:[%s5607_s2] sm:$0xff]   ;;  %v1621_v1 = vld [vmem:[#allocation2 + $0x18] sm:$0xff] }
 0x408   : > { %4141 = vmatprep.subr.bf16.mxu0 %v4492_v59  ;;  %v1623_v6 = vpack.c.bf16 %v1621_v1, %v1620_v63  ;;  %s5609_s17 = scalar_lea.vmem %s5608_s5, %s5082_s0 }
 0x409   : > { %4142 = vmatpush3.bf16.msra.mxu0 %v4492_v59  ;;  %v3964_v33 = vld [vmem:[%s5609_s17] ss:$0 sm:$0xff] }
 0x40a   : > { %4143 = vmatprep.subr.bf16.mxu0 %v4493_v60 }
 0x40d   : > { %4144 = vmatpush3.bf16.msra.mxu0 %v4493_v60 }
 0x40e   : > { %4149 = vmatprep.subr.bf16.mxu0 %v4494_v4 }
 0x410   : > { %4146 = vmatmul.mubr.msk.bf16.vlgmr.msra.gmra.mxu0 %vm1647_vm9, %v1623_v6 }
 0x411   : > { %4150 = vmatpush3.bf16.msra.mxu0 %v4494_v4  ;;  %4153 = vmatprep.mubr.msk.bf16.mxu0 %vm1647_vm9, %v1622_v0 }
 0x412   : > { %4151 = vmatprep.subr.bf16.mxu0 %v4495_v7 }
 0x415   : > { %4152 = vmatpush3.bf16.msra.mxu0 %v4495_v7 }
 0x416   : > { %4157 = vmatprep.subr.bf16.mxu0 %v4496_v2 }
 0x418   : > { %4154 = vmatmul.mubr.msk.bf16.vlgmr.msra.gmra.mxu0 %vm1647_vm9, %v1623_v6 }
 0x419   : > { %4161 = vmatprep.mubr.msk.bf16.mxu0 %vm1647_vm9, %v1622_v0  ;;  %4158 = vmatpush3.bf16.msra.mxu0 %v4496_v2 }
 0x41a   : > { %4159 = vmatprep.subr.bf16.mxu0 %v4497_v8 }
 0x41d   : > { %4160 = vmatpush3.bf16.msra.mxu0 %v4497_v8 }
 0x41e   : > { %4171 = vmatprep.subr.bf16.mxu0 %v4797_v10 }
 0x420   : > { %4162 = vmatmul.mubr.msk.bf16.vlgmr.msra.gmra.mxu0 %vm1647_vm9, %v1623_v6 }
 0x421   : > { %4173 = vmatprep.mubr.msk.bf16.mxu0 %vm4800_vm10, %v4797_v10 }
 0x4d0   : > { %v4147_v9 = vpop.f32.mrf.mxu0 }
 0x4d1   : > { %v1697_v36 = vadd.f32 %v4147_v9, %v3964_v33 }
 0x4d2   : > { %v1688_v16 = vpop.f32.mrf.mxu0 }
 0x4d3   : > { %v1689_v38 = vadd.f32 %v3964_v33, %v1688_v16 }
 0x4d4   : > { %v4148_v17 = vpop.f32.mrf.mxu0 }
 0x4d5   : > { %v1700_v34 = vadd.f32 %v4148_v17, %v3964_v33 }
 0x4d6   : > { %v1691_v18 = vpop.f32.mrf.mxu0 }
 0x4d7   : > { %v1692_v37 = vadd.f32 %v3964_v33, %v1691_v18  ;;  %v5206_v39 = vpack.c.bf16 %v1700_v34, %v1697_v36 }
 0x4d8   : > { %v4155_v20 = vpop.f32.mrf.mxu0 }
 0x4d9   : > { %v1769_v25 = vadd.f32 %v4155_v20, %v3969_v21  ;;  %v5208_v40 = vpack.c.bf16 %v1692_v37, %v1689_v38 }
 0x4da   : > { %v1760_v23 = vpop.f32.mrf.mxu0 }
 0x4db   : > { %v1761_v28 = vadd.f32 %v3969_v21, %v1760_v23 }
 0x4dc   : > { %v4156_v24 = vpop.f32.mrf.mxu0 }
 0x4dd   : > { %v1772_v26 = vadd.f32 %v4156_v24, %v3969_v21 }
 0x4de   : > { %v1763_v27 = vpop.f32.mrf.mxu0 }
 0x4df   : > { %v5193_v29 = vpack.c.bf16 %v1772_v26, %v1769_v25  ;;  %v1764_v30 = vadd.f32 %v3969_v21, %v1763_v27 }
 0x4e0   : > { %v4163_v41 = vpop.f32.mrf.mxu0 }
 0x4e1   : > { %v5195_v31 = vpack.c.bf16 %v1764_v30, %v1761_v28  ;;  %v1905_v32 = vsel %vm1853_vm11, %v5193_v29, 0  ;;  %v1841_v44 = vadd.f32 %v4163_v41, %v3974_v42 }
 0x4e2   : > { %4172 = vmatpush3.bf16.xpose.msra.mxu0 %v1905_v32  ;;  %v1832_v43 = vpop.f32.mrf.mxu0 }
 0x4e3   : > { %v1858_v35 = vsel %vm1853_vm11, %v5195_v31, 0  ;;  %4183 = vmatprep.subr.bf16.mxu0 %v4797_v10  ;;  %v1833_v46 = vadd.f32 %v3974_v42, %v1832_v43 }
 0x4e4   : > { %4166 = vmatpush3.bf16.xpose.msra.mxu1 %v1858_v35  ;;  %v4164_v45 = vpop.f32.mrf.mxu0 }
 0x4e5   : > { %4177 = vmatprep.subr.bf16.mxu1 %v4797_v10  ;;  %v1844_v47 = vadd.f32 %v4164_v45, %v3974_v42 }
 0x4e6   : > { %v1835_v48 = vpop.f32.mrf.mxu0 }
 0x4e7   : > { %v5221_v49 = vpack.c.bf16 %v1844_v47, %v1841_v44  ;;  %v1836_v50 = vadd.f32 %v3974_v42, %v1835_v48 }
 0x4e9   : > { %4174 = vmatmul.mubr.msk.bf16.vlgmr.msra.gmra.mxu0 %vm1853_vm11, %v5206_v39  ;;  %v5223_v51 = vpack.c.bf16 %v1836_v50, %v1833_v46 }
 0x4ea   : > { %4185 = vmatprep.mubr.msk.bf16.mxu0 %vm4800_vm10, %v4797_v10  ;;  %4184 = vmatpush3.bf16.msra.mxu0 %v5221_v49 }
 0x4eb   : > { %4168 = vmatmul.mubr.msk.bf16.vlgmr.msra.gmra.mxu1 %vm1853_vm11, %v5208_v40  ;;  %4195 = vmatprep.subr.bf16.mxu0 %v4797_v10 }
 0x4ec   : > { %4179 = vmatprep.mubr.msk.bf16.mxu1 %vm4800_vm10, %v4797_v10  ;;  %4178 = vmatpush3.bf16.msra.mxu1 %v5223_v51 }
 0x4ed   : > { %4189 = vmatprep.subr.bf16.mxu1 %v4797_v10 }
 0x5a9   : > { %v1941_v52 = vpop.f32.mrf.mxu0 }
 0x5aa   : > { %v1950_v53 = vmul.f32 0.35355338, %v1941_v52 }
 0x5ab   : > { %v1894_v54 = vpop.f32.mrf.mxu1  ;;  %v4175_v55 = vpop.f32.mrf.mxu0 }
 0x5ac   : > { %v1954_v56 = vadd.f32 %v1950_v53, %v5146_v22  ;;  %v1948_v57 = vmul.f32 0.35355338, %v1894_v54 }
 0x5ad   : > { %v4169_v58 = vpop.f32.mrf.mxu1  ;;  %v1944_v59 = vpop.f32.mrf.mxu0 }
 0x5ae   : > { %v1952_v60 = vadd.f32 %v1948_v57, %v5142_v19  ;;  %v1951_v61 = vmul.f32 0.35355338, %v1944_v59  ;;  %v1963_v62 = vsel %vm1956_vm12, %v1954_v56, -inf }
 0x5af   : > { %1964 = vmax.xlane.f32.xlu1 %v1963_v62  ;;  %v1897_v63 = vpop.f32.mrf.mxu1  ;;  %v4176_v0 = vpop.f32.mrf.mxu0 }
 0x5b0   : > { %v1955_v1 = vadd.f32 %v1951_v61, %v5146_v22  ;;  %v1949_v4 = vmul.f32 0.35355338, %v1897_v63  ;;  %v1957_v6 = vsel %vm1956_vm12, %v1952_v60, -inf }
 0x5b1   : > { %1958 = vmax.xlane.f32.xlu0 %v1957_v6  ;;  %v4170_v7 = vpop.f32.mrf.mxu1 }
 0x5b2   : > { %v1953_v2 = vadd.f32 %v1949_v4, %v5142_v19  ;;  %v1966_v8 = vsel %vm1956_vm12, %v1955_v1, -inf }
 0x5b3   : > { %1967 = vmax.xlane.f32.xlu1 %v1966_v8 }
 0x5b4   : > { %v1960_v9 = vsel %vm1956_vm12, %v1953_v2, -inf }
 0x5b5   : > { %1961 = vmax.xlane.f32.xlu0 %v1960_v9 }
 0x5c4   : > { %2148 = vrot.lane.b32.xlu1 %v5193_v29, %s4801_s13 }
 0x638   : > { %v1965_v16 = vpop.xlane.xlu1 %1964 }
 0x639   : > { %v1971_v17 = vsub.f32 %v1954_v56, %v1965_v16 }
 0x63a   : > { %v1959_v18 = vpop.xlane.xlu0 %1958 }
 0x63b   : > { %v1977_v20 = vmul.f32 1.442695, %v1971_v17  ;;  %v1969_v21 = vsub.f32 %v1952_v60, %v1959_v18 }
 0x63c   : > { %v1968_v23 = vpop.xlane.xlu1 %1967 }
 0x63d   : > { %4510 = vpow2.f32 %v1977_v20  ;;  %v1973_v24 = vmul.f32 1.442695, %v1969_v21  ;;  %v1972_v25 = vsub.f32 %v1955_v1, %v1968_v23 }
 0x63e   : > { %v1962_v26 = vpop.xlane.xlu0 %1961 }
 0x63f   : > { %4512 = vpow2.f32 %v1973_v24  ;;  %v1979_v27 = vmul.f32 1.442695, %v1972_v25  ;;  %v1970_v28 = vsub.f32 %v1953_v2, %v1962_v26 }
 0x640   : > { %v2149_v42 = vpop.permute.xlu1 %2148 }
 0x641   : > { %4514 = vpow2.f32 %v1979_v27  ;;  %v1975_v30 = vmul.f32 1.442695, %v1970_v28  ;;  %v2154_v56 = vsel %vm1853_vm11, %v2149_v42, 0 }
 0x643   : > { %4516 = vpow2.f32 %v1975_v30 }
 0x64a   : > { %v4511_v32 = vpop.eup %4510 }
 0x64b   : > { %v1987_v33 = vsel %vm1956_vm12, %v4511_v32, 0.0 }
 0x64c   : > { %v4513_v34 = vpop.eup %4512  ;;  %1988 = vadd.xlane.f32.xlu0 %v1987_v33 }
 0x64d   : > { %v1981_v37 = vsel %vm1956_vm12, %v4513_v34, 0.0 }
 0x64e   : > { %v4515_v35 = vpop.eup %4514 }
 0x64f   : > { %v1990_v36 = vsel %vm1956_vm12, %v4515_v35, 0.0 }
 0x650   : > { %v4517_v38 = vpop.eup %4516  ;;  %1991 = vadd.xlane.f32.xlu1 %v1990_v36  ;;  %1982 = vadd.xlane.f32.xlu0 %v1981_v37 }
 0x651   : > { %v1984_v41 = vsel %vm1956_vm12, %v4517_v38, 0.0 }
 0x654   : > { %1985 = vadd.xlane.f32.xlu1 %v1984_v41 }
 0x665   : > { %2092 = vrot.lane.b32.xlu1 %v5208_v40, %s4801_s13 }
 0x666   : > { %2095 = vrot.lane.b32.xlu0 %v5195_v31, %s4801_s13 }
 0x669   : > { %2145 = vrot.lane.b32.xlu1 %v5206_v39, %s4801_s13 }
 0x6d5   : > { %v1989_v43 = vpop.xlane.xlu0 %1988 }
 0x6d6   : > { %4518 = vrcp.f32 %v1989_v43 }
 0x6d9   : > { %v1992_v44 = vpop.xlane.xlu1 %1991  ;;  %v1983_v45 = vpop.xlane.xlu0 %1982 }
 0x6da   : > { %4520 = vrcp.f32 %v1992_v44 }
 0x6db   : > { %4522 = vrcp.f32 %v1983_v45 }
 0x6dd   : > { %v1986_v46 = vpop.xlane.xlu1 %1985  ;;  %v2096_v59 = vpop.permute.xlu0 %2095 }
 0x6de   : > { %4524 = vrcp.f32 %v1986_v46  ;;  %v2101_v62 = vsel %vm1853_vm11, %v2096_v59, 0 }
 0x6e1   : > { %v2093_v60 = vpop.permute.xlu1 %2092 }
 0x6e3   : > { %v4519_v47 = vpop.eup %4518 }
 0x6e4   : > { %v1999_v50 = vmul.f32 %v4519_v47, %v4511_v32 }
 0x6e5   : > { %v2146_v63 = vpop.permute.xlu1 %2145 }
 0x6e7   : > { %v4521_v48 = vpop.eup %4520 }
 0x6e8   : > { %v2000_v52 = vmul.f32 %v4521_v48, %v4515_v35  ;;  %v4523_v53 = vpop.eup %4522 }
 0x6e9   : > { %v1997_v57 = vmul.f32 %v4523_v53, %v4513_v34 }
 0x6ea   : > { %v2002_v54 = vpack.c.bf16 %v2000_v52, %v1999_v50 }
 0x6eb   : > { %v4525_v55 = vpop.eup %4524 }
 0x6ec   : > { %4186 = vmatmul.mubr.msk.bf16.vlgmr.msra.gmra.mxu0 %vm1956_vm12, %v2002_v54  ;;  %v1998_v58 = vmul.f32 %v4525_v55, %v4517_v38 }
 0x6ed   : > { %4196 = vmatpush3.bf16.xpose.msra.mxu0 %v2154_v56  ;;  %4197 = vmatprep.mubr.msk.bf16.mxu0 %vm4800_vm10, %v4797_v10 }
 0x6ee   : > { %v2001_v61 = vpack.c.bf16 %v1998_v58, %v1997_v57  ;;  %4207 = vmatprep.subr.bf16.mxu0 %v4797_v10 }
 0x6f0   : > { %4180 = vmatmul.mubr.msk.bf16.vlgmr.msra.gmra.mxu1 %vm1956_vm12, %v2001_v61 }
 0x6f1   : > { %4190 = vmatpush3.bf16.xpose.msra.mxu1 %v2101_v62  ;;  %4191 = vmatprep.mubr.msk.bf16.mxu1 %vm4800_vm10, %v4797_v10 }
 0x6f2   : > { %4201 = vmatprep.subr.bf16.mxu1 %v4797_v10 }
 0x6f4   : > { %4198 = vmatmul.mubr.msk.bf16.vlgmr.msra.gmra.mxu0 %vm1853_vm11, %v2146_v63 }
 0x6f5   : > { %4209 = vmatprep.mubr.msk.bf16.mxu0 %vm4800_vm10, %v4797_v10 }
 0x6f8   : > { %4192 = vmatmul.mubr.msk.bf16.vlgmr.msra.gmra.mxu1 %vm1853_vm11, %v2093_v60 }
 0x6f9   : > { %4203 = vmatprep.mubr.msk.bf16.mxu1 %vm4800_vm10, %v4797_v10 }
 0x7ac   : > { %v5265_v0 = vpop.f32.mrf.mxu0 }
 0x7ae   : > { %v4187_v1 = vpop.f32.mrf.mxu0 }
 0x7b0   : > { %v5267_v4 = vpop.f32.mrf.mxu1  ;;  %v5269_v6 = vpop.f32.mrf.mxu0 }
 0x7b2   : > { %v4181_v7 = vpop.f32.mrf.mxu1  ;;  %v4188_v2 = vpop.f32.mrf.mxu0 }
 0x7b4   : > { %v5271_v8 = vpop.f32.mrf.mxu1  ;;  %v2190_v9 = vpop.f32.mrf.mxu0 }
 0x7b5   : > { %v2199_v21 = vmul.f32 0.35355338, %v2190_v9 }
 0x7b6   : > { %v4182_v16 = vpop.f32.mrf.mxu1  ;;  %v4199_v17 = vpop.f32.mrf.mxu0 }
 0x7b7   : > { %v2203_v28 = vadd.f32 %v2199_v21, %v5146_v22 }
 0x7b8   : > { %v2137_v18 = vpop.f32.mrf.mxu1  ;;  %v2193_v20 = vpop.f32.mrf.mxu0 }
 0x7b9   : > { %v2197_v23 = vmul.f32 0.35355338, %v2137_v18  ;;  %v2200_v30 = vmul.f32 0.35355338, %v2193_v20  ;;  %v2211_v37 = vsel %vm1956_vm12, %v2203_v28, -inf }
 0x7ba   : > { %v4193_v24 = vpop.f32.mrf.mxu1  ;;  %v4200_v25 = vpop.f32.mrf.mxu0 }
 0x7bb   : > { %v2201_v26 = vadd.f32 %v2197_v23, %v5142_v19  ;;  %v2204_v36 = vadd.f32 %v2200_v30, %v5146_v22 }
 0x7bc   : > { %v2140_v27 = vpop.f32.mrf.mxu1 }
 0x7bd   : > { %v2198_v32 = vmul.f32 0.35355338, %v2140_v27  ;;  %v2205_v33 = vsel %vm1956_vm12, %v2201_v26, -inf  ;;  %v2214_v41 = vsel %vm1956_vm12, %v2204_v36, -inf }
 0x7be   : > { %2206 = vmax.xlane.f32.xlu0 %v2205_v33  ;;  %v4194_v34 = vpop.f32.mrf.mxu1 }
 0x7bf   : > { %v2202_v35 = vadd.f32 %v2198_v32, %v5142_v19 }
 0x7c1   : > { %v2208_v38 = vsel %vm1956_vm12, %v2202_v35, -inf }
 0x7c2   : > { %2212 = vmax.xlane.f32.xlu0 %v2211_v37  ;;  %2209 = vmax.xlane.f32.xlu1 %v2208_v38 }
 0x7c6   : > { %2215 = vmax.xlane.f32.xlu0 %v2214_v41 }
 0x7d3   : > { %2300 = vrot.lane.b32.xlu1 %v5221_v49, %s4801_s13 }
 0x7d7   : > { %2349 = vrot.lane.b32.xlu1 %v5195_v31, %s4802_s25 }
 0x847   : > { %v2207_v42 = vpop.xlane.xlu0 %2206 }
 0x848   : > { %v2217_v43 = vsub.f32 %v2201_v26, %v2207_v42 }
 0x84a   : > { %v2221_v47 = vmul.f32 1.442695, %v2217_v43 }
 0x84b   : > { %v2213_v44 = vpop.xlane.xlu0 %2212  ;;  %v2210_v45 = vpop.xlane.xlu1 %2209 }
 0x84c   : > { %v2219_v46 = vsub.f32 %v2203_v28, %v2213_v44  ;;  %v2218_v50 = vsub.f32 %v2202_v35, %v2210_v45 }
 0x84e   : > { %v2225_v48 = vmul.f32 1.442695, %v2219_v46  ;;  %v2223_v55 = vmul.f32 1.442695, %v2218_v50 }
 0x84f   : > { %v2216_v52 = vpop.xlane.xlu0 %2215  ;;  %v2301_v53 = vpop.permute.xlu1 %2300 }
 0x850   : > { %4526 = vpow2.f32 %v2225_v48  ;;  %v2220_v54 = vsub.f32 %v2204_v36, %v2216_v52  ;;  %4208 = vmatpush3.bf16.msra.mxu0 %v2301_v53 }
 0x851   : > { %4219 = vmatprep.subr.bf16.mxu0 %v4797_v10  ;;  %4528 = vpow2.f32 %v2221_v47 }
 0x852   : > { %v2227_v56 = vmul.f32 1.442695, %v2220_v54 }
 0x853   : > { %v2350_v7 = vpop.permute.xlu1 %2349 }
 0x854   : > { %4530 = vpow2.f32 %v2227_v56  ;;  %v2355_v35 = vsel %vm1853_vm11, %v2350_v7, 0 }
 0x855   : > { %4532 = vpow2.f32 %v2223_v55 }
 0x85d   : > { %v4527_v57 = vpop.eup %4526 }
 0x85e   : > { %v2235_v58 = vsel %vm1956_vm12, %v4527_v57, 0.0  ;;  %v4529_v59 = vpop.eup %4528 }
 0x85f   : > { %2236 = vadd.xlane.f32.xlu0 %v2235_v58  ;;  %v2229_v61 = vsel %vm1956_vm12, %v4529_v59, 0.0 }
 0x861   : > { %v4531_v60 = vpop.eup %4530 }
 0x862   : > { %v2238_v62 = vsel %vm1956_vm12, %v4531_v60, 0.0  ;;  %v4533_v63 = vpop.eup %4532 }
 0x863   : > { %2230 = vadd.xlane.f32.xlu0 %v2229_v61  ;;  %2239 = vadd.xlane.f32.xlu1 %v2238_v62  ;;  %v2232_v1 = vsel %vm1956_vm12, %v4533_v63, 0.0 }
 0x867   : > { %2233 = vadd.xlane.f32.xlu1 %v2232_v1 }
 0x878   : > { %2400 = vrot.lane.b32.xlu1 %v5193_v29, %s4802_s25 }
 0x879   : > { %2252 = vrot.lane.b32.xlu0 %v5223_v51, %s4801_s13 }
 0x87c   : > { %2398 = vrot.lane.b32.xlu1 %v5206_v39, %s4802_s25 }
 0x87d   : > { %2347 = vrot.lane.b32.xlu0 %v5208_v40, %s4802_s25 }
 0x8e8   : > { %v2237_v2 = vpop.xlane.xlu0 %2236 }
 0x8e9   : > { %4534 = vrcp.f32 %v2237_v2 }
 0x8ec   : > { %v2231_v9 = vpop.xlane.xlu0 %2230  ;;  %v2240_v16 = vpop.xlane.xlu1 %2239 }
 0x8ed   : > { %4536 = vrcp.f32 %v2240_v16 }
 0x8ee   : > { %4538 = vrcp.f32 %v2231_v9 }
 0x8f0   : > { %v2253_v17 = vpop.permute.xlu0 %2252  ;;  %v2234_v18 = vpop.xlane.xlu1 %2233 }
 0x8f1   : > { %4540 = vrcp.f32 %v2234_v18  ;;  %4202 = vmatpush3.bf16.msra.mxu1 %v2253_v17 }
 0x8f2   : > { %4213 = vmatprep.subr.bf16.mxu1 %v4797_v10 }
 0x8f4   : > { %v2401_v26 = vpop.permute.xlu1 %2400  ;;  %v2348_v37 = vpop.permute.xlu0 %2347 }
 0x8f5   : > { %v2406_v33 = vsel %vm1853_vm11, %v2401_v26, 0 }
 0x8f6   : > { %v4535_v20 = vpop.eup %4534 }
 0x8f7   : > { %v2247_v24 = vmul.f32 %v4535_v20, %v4527_v57 }
 0x8f8   : > { %v2399_v36 = vpop.permute.xlu1 %2398 }
 0x8fa   : > { %v4537_v21 = vpop.eup %4536 }
 0x8fb   : > { %v4539_v23 = vpop.eup %4538  ;;  %v2248_v25 = vmul.f32 %v4537_v21, %v4531_v60 }
 0x8fc   : > { %v2245_v30 = vmul.f32 %v4539_v23, %v4529_v59 }
 0x8fd   : > { %v2250_v28 = vpack.c.bf16 %v2248_v25, %v2247_v24 }
 0x8fe   : > { %v4541_v27 = vpop.eup %4540 }
 0x8ff   : > { %v2246_v32 = vmul.f32 %v4541_v27, %v4533_v63  ;;  %4210 = vmatmul.mubr.msk.bf16.vlgmr.msra.gmra.mxu0 %vm1956_vm12, %v2250_v28 }
 0x900   : > { %4220 = vmatpush3.bf16.xpose.msra.mxu0 %v2406_v33  ;;  %4221 = vmatprep.mubr.msk.bf16.mxu0 %vm4800_vm10, %v4797_v10 }
 0x901   : > { %v2249_v34 = vpack.c.bf16 %v2246_v32, %v2245_v30  ;;  %4231 = vmatprep.subr.bf16.mxu0 %v4797_v10 }
 0x903   : > { %4204 = vmatmul.mubr.msk.bf16.vlgmr.msra.gmra.mxu1 %vm1956_vm12, %v2249_v34 }
 0x904   : > { %4214 = vmatpush3.bf16.xpose.msra.mxu1 %v2355_v35  ;;  %4215 = vmatprep.mubr.msk.bf16.mxu1 %vm4800_vm10, %v4797_v10 }
 0x905   : > { %4225 = vmatprep.subr.bf16.mxu1 %v4797_v10 }
 0x907   : > { %4222 = vmatmul.mubr.msk.bf16.vlgmr.msra.gmra.mxu0 %vm1853_vm11, %v2399_v36 }
 0x908   : > { %4233 = vmatprep.mubr.msk.bf16.mxu0 %vm4800_vm10, %v4797_v10 }
 0x90b   : > { %4216 = vmatmul.mubr.msk.bf16.vlgmr.msra.gmra.mxu1 %vm1853_vm11, %v2348_v37 }
 0x90c   : > { %4227 = vmatprep.mubr.msk.bf16.mxu1 %vm4800_vm10, %v4797_v10 }
 0x9bf   : > { %v5315_v38 = vpop.f32.mrf.mxu0 }
 0x9c1   : > { %v4211_v41 = vpop.f32.mrf.mxu0 }
 0x9c3   : > { %v5317_v42 = vpop.f32.mrf.mxu1  ;;  %v5319_v43 = vpop.f32.mrf.mxu0 }
 0x9c4   : > { %v4455_v44 = vpack.i.bf16 %v5319_v43, %v5315_v38 }
 0x9c5   : > { %v4205_v45 = vpop.f32.mrf.mxu1  ;;  %v4212_v46 = vpop.f32.mrf.mxu0 }
 0x9c7   : > { %v5323_v47 = vpop.f32.mrf.mxu1  ;;  %v2442_v50 = vpop.f32.mrf.mxu0 }
 0x9c8   : > { %v4450_v48 = vpack.i.bf16 %v5323_v47, %v5317_v42  ;;  %v2451_v55 = vmul.f32 0.35355338, %v2442_v50 }
 0x9c9   : > { %v4206_v52 = vpop.f32.mrf.mxu1  ;;  %v4223_v53 = vpop.f32.mrf.mxu0 }
 0x9ca   : > { %v2455_v62 = vadd.f32 %v2451_v55, %v5146_v22 }
 0x9cb   : > { %v2391_v54 = vpop.f32.mrf.mxu1  ;;  %v2445_v57 = vpop.f32.mrf.mxu0 }
 0x9cc   : > { %v2449_v56 = vmul.f32 0.35355338, %v2391_v54  ;;  %v2452_v63 = vmul.f32 0.35355338, %v2445_v57  ;;  %v2463_v17 = vsel %vm1956_vm12, %v2455_v62, -inf }
 0x9cd   : > { %v4217_v58 = vpop.f32.mrf.mxu1  ;;  %v4224_v60 = vpop.f32.mrf.mxu0 }
 0x9ce   : > { %v2453_v59 = vadd.f32 %v2449_v56, %v5142_v19  ;;  %v2456_v16 = vadd.f32 %v2452_v63, %v5146_v22 }
 0x9cf   : > { %v2394_v61 = vpop.f32.mrf.mxu1 }
 0x9d0   : > { %v2450_v1 = vmul.f32 0.35355338, %v2394_v61  ;;  %v2457_v7 = vsel %vm1956_vm12, %v2453_v59, -inf  ;;  %v2466_v20 = vsel %vm1956_vm12, %v2456_v16, -inf }
 0x9d1   : > { %2458 = vmax.xlane.f32.xlu0 %v2457_v7  ;;  %v4218_v2 = vpop.f32.mrf.mxu1 }
 0x9d2   : > { %v2454_v9 = vadd.f32 %v2450_v1, %v5142_v19 }
 0x9d4   : > { %v2460_v18 = vsel %vm1956_vm12, %v2454_v9, -inf }
 0x9d5   : > { %2464 = vmax.xlane.f32.xlu0 %v2463_v17  ;;  %2461 = vmax.xlane.f32.xlu1 %v2460_v18 }
 0x9d9   : > { %2467 = vmax.xlane.f32.xlu0 %v2466_v20 }
 0x9e6   : > { %2550 = vrot.lane.b32.xlu1 %v5221_v49, %s4802_s25 }
 0x9ea   : > { %2599 = vrot.lane.b32.xlu1 %v5195_v31, %s4803_s16 }
 0xa5a   : > { %v2459_v21 = vpop.xlane.xlu0 %2458 }
 0xa5b   : > { %v2469_v23 = vsub.f32 %v2453_v59, %v2459_v21 }
 0xa5d   : > { %v2473_v27 = vmul.f32 1.442695, %v2469_v23 }
 0xa5e   : > { %v2465_v24 = vpop.xlane.xlu0 %2464  ;;  %v2462_v25 = vpop.xlane.xlu1 %2461 }
 0xa5f   : > { %v2471_v26 = vsub.f32 %v2455_v62, %v2465_v24  ;;  %v2470_v30 = vsub.f32 %v2454_v9, %v2462_v25 }
 0xa61   : > { %v2477_v28 = vmul.f32 1.442695, %v2471_v26  ;;  %v2475_v35 = vmul.f32 1.442695, %v2470_v30 }
 0xa62   : > { %v2468_v32 = vpop.xlane.xlu0 %2467  ;;  %v2551_v33 = vpop.permute.xlu1 %2550 }
 0xa63   : > { %4542 = vpow2.f32 %v2477_v28  ;;  %v2472_v34 = vsub.f32 %v2456_v16, %v2468_v32  ;;  %4232 = vmatpush3.bf16.msra.mxu0 %v2551_v33 }
 0xa64   : > { %4243 = vmatprep.subr.bf16.mxu0 %v4797_v10  ;;  %4544 = vpow2.f32 %v2473_v27 }
 0xa65   : > { %v2479_v36 = vmul.f32 1.442695, %v2472_v34 }
 0xa66   : > { %v2600_v54 = vpop.permute.xlu1 %2599 }
 0xa67   : > { %4546 = vpow2.f32 %v2479_v36  ;;  %v2605_v17 = vsel %vm1853_vm11, %v2600_v54, 0 }
 0xa68   : > { %4548 = vpow2.f32 %v2475_v35 }
 0xa70   : > { %v4543_v31 = vpop.eup %4542 }
 0xa71   : > { %v2487_v37 = vsel %vm1956_vm12, %v4543_v31, 0.0  ;;  %v4545_v41 = vpop.eup %4544 }
 0xa72   : > { %2488 = vadd.xlane.f32.xlu0 %v2487_v37  ;;  %v2481_v46 = vsel %vm1956_vm12, %v4545_v41, 0.0 }
 0xa74   : > { %v4547_v45 = vpop.eup %4546 }
 0xa75   : > { %v2490_v50 = vsel %vm1956_vm12, %v4547_v45, 0.0  ;;  %v4549_v52 = vpop.eup %4548 }
 0xa76   : > { %2482 = vadd.xlane.f32.xlu0 %v2481_v46  ;;  %2491 = vadd.xlane.f32.xlu1 %v2490_v50  ;;  %v2484_v53 = vsel %vm1956_vm12, %v4549_v52, 0.0 }
 0xa7a   : > { %2485 = vadd.xlane.f32.xlu1 %v2484_v53 }
 0xa8b   : > { %2650 = vrot.lane.b32.xlu1 %v5193_v29, %s4803_s16 }
 0xa8c   : > { %2503 = vrot.lane.b32.xlu0 %v5223_v51, %s4802_s25 }
 0xa8f   : > { %2648 = vrot.lane.b32.xlu1 %v5206_v39, %s4803_s16 }
 0xa90   : > { %2597 = vrot.lane.b32.xlu0 %v5208_v40, %s4803_s16 }
 0xafb   : > { %v2489_v55 = vpop.xlane.xlu0 %2488 }
 0xafc   : > { %4550 = vrcp.f32 %v2489_v55 }
 0xaff   : > { %v2483_v56 = vpop.xlane.xlu0 %2482  ;;  %v2492_v57 = vpop.xlane.xlu1 %2491 }
 0xb00   : > { %4552 = vrcp.f32 %v2492_v57 }
 0xb01   : > { %4554 = vrcp.f32 %v2483_v56 }
 0xb03   : > { %v2504_v58 = vpop.permute.xlu0 %2503  ;;  %v2486_v59 = vpop.xlane.xlu1 %2485 }
 0xb04   : > { %4556 = vrcp.f32 %v2486_v59  ;;  %4226 = vmatpush3.bf16.msra.mxu1 %v2504_v58 }
 0xb05   : > { %4237 = vmatprep.subr.bf16.mxu1 %v4797_v10 }
 0xb07   : > { %v2651_v63 = vpop.permute.xlu1 %2650  ;;  %v2598_v20 = vpop.permute.xlu0 %2597 }
 0xb08   : > { %v2656_v9 = vsel %vm1853_vm11, %v2651_v63, 0 }
 0xb09   : > { %v4551_v29 = vpop.eup %4550 }
 0xb0a   : > { %v2499_v39 = vmul.f32 %v4551_v29, %v4543_v31 }
 0xb0b   : > { %v2649_v18 = vpop.permute.xlu1 %2648 }
 0xb0d   : > { %v4553_v60 = vpop.eup %4552 }
 0xb0e   : > { %v4555_v61 = vpop.eup %4554  ;;  %v2500_v62 = vmul.f32 %v4553_v60, %v4547_v45 }
 0xb0f   : > { %v2497_v7 = vmul.f32 %v4555_v61, %v4545_v41 }
 0xb10   : > { %v2502_v1 = vpack.c.bf16 %v2500_v62, %v2499_v39 }
 0xb11   : > { %v4557_v40 = vpop.eup %4556 }
 0xb12   : > { %v2498_v2 = vmul.f32 %v4557_v40, %v4549_v52  ;;  %4234 = vmatmul.mubr.msk.bf16.vlgmr.msra.gmra.mxu0 %vm1956_vm12, %v2502_v1 }
 0xb13   : > { %4244 = vmatpush3.bf16.xpose.msra.mxu0 %v2656_v9  ;;  %4245 = vmatprep.mubr.msk.bf16.mxu0 %vm4800_vm10, %v4797_v10 }
 0xb14   : > { %v2501_v16 = vpack.c.bf16 %v2498_v2, %v2497_v7  ;;  %4255 = vmatprep.subr.bf16.mxu0 %v4797_v10 }
 0xb16   : > { %4228 = vmatmul.mubr.msk.bf16.vlgmr.msra.gmra.mxu1 %vm1956_vm12, %v2501_v16 }
 0xb17   : > { %4238 = vmatpush3.bf16.xpose.msra.mxu1 %v2605_v17  ;;  %4239 = vmatprep.mubr.msk.bf16.mxu1 %vm4800_vm10, %v4797_v10 }
 0xb18   : > { %4249 = vmatprep.subr.bf16.mxu1 %v4797_v10 }
 0xb1a   : > { %4246 = vmatmul.mubr.msk.bf16.vlgmr.msra.gmra.mxu0 %vm1853_vm11, %v2649_v18 }
 0xb1b   : > { %4257 = vmatprep.mubr.msk.bf16.mxu0 %vm4800_vm10, %v4797_v10 }
 0xb1e   : > { %4240 = vmatmul.mubr.msk.bf16.vlgmr.msra.gmra.mxu1 %vm1853_vm11, %v2598_v20 }
 0xb1f   : > { %4251 = vmatprep.mubr.msk.bf16.mxu1 %vm4800_vm10, %v4797_v10 }
 0xbd2   : > { %v5369_v21 = vpop.f32.mrf.mxu0 }
 0xbd4   : > { %v4235_v23 = vpop.f32.mrf.mxu0 }
 0xbd6   : > { %v5371_v24 = vpop.f32.mrf.mxu1  ;;  %v5373_v25 = vpop.f32.mrf.mxu0 }
 0xbd7   : > { %v4465_v26 = vpack.i.bf16 %v5373_v25, %v5369_v21 }
 0xbd8   : > { %v4229_v27 = vpop.f32.mrf.mxu1  ;;  %v4236_v28 = vpop.f32.mrf.mxu0 }
 0xbda   : > { %v2546_v30 = vpop.f32.mrf.mxu1  ;;  %v2692_v33 = vpop.f32.mrf.mxu0 }
 0xbdb   : > { %v4460_v32 = vpack.i.bf16 %v2546_v30, %v5371_v24  ;;  %v2701_v10 = vmul.f32 0.35355338, %v2692_v33 }
 0xbdc   : > { %v4230_v34 = vpop.f32.mrf.mxu1  ;;  %v4247_v35 = vpop.f32.mrf.mxu0 }
 0xbdd   : > { %v2705_v52 = vadd.f32 %v2701_v10, %v5146_v22  ;;  %v4498_v10 = vld [vmem:[%s5116_s29 + $0x8] sm:$0xff]  }
 0xbde   : > { %v2641_v36 = vpop.f32.mrf.mxu1  ;;  %v2695_v37 = vpop.f32.mrf.mxu0 }
 0xbdf   : > { %v2699_v31 = vmul.f32 0.35355338, %v2641_v36  ;;  %v2702_v53 = vmul.f32 0.35355338, %v2695_v37  ;;  %v2713_v59 = vsel %vm1956_vm12, %v2705_v52, -inf }
 0xbe0   : > { %v4241_v41 = vpop.f32.mrf.mxu1  ;;  %v4248_v46 = vpop.f32.mrf.mxu0 }
 0xbe1   : > { %v2703_v45 = vadd.f32 %v2699_v31, %v5142_v19  ;;  %v2706_v58 = vadd.f32 %v2702_v53, %v5146_v22  ;;  %v4499_v31 = vld [vmem:[%s5116_s29] sm:$0xff]  }
 0xbe2   : > { %v2644_v50 = vpop.f32.mrf.mxu1 }
 0xbe3   : > { %v2700_v54 = vmul.f32 0.35355338, %v2644_v50  ;;  %v2707_v55 = vsel %vm1956_vm12, %v2703_v45, -inf  ;;  %v2716_v60 = vsel %vm1956_vm12, %v2706_v58, -inf }
 0xbe4   : > { %2708 = vmax.xlane.f32.xlu0 %v2707_v55  ;;  %v4242_v56 = vpop.f32.mrf.mxu1 }
 0xbe5   : > { %v2704_v57 = vadd.f32 %v2700_v54, %v5142_v19 }
 0xbe7   : > { %v2710_v29 = vsel %vm1956_vm12, %v2704_v57, -inf }
 0xbe8   : > { %2714 = vmax.xlane.f32.xlu0 %v2713_v59  ;;  %2711 = vmax.xlane.f32.xlu1 %v2710_v29 }
 0xbec   : > { %2717 = vmax.xlane.f32.xlu0 %v2716_v60 }
 0xc6d   : > { %v2709_v61 = vpop.xlane.xlu0 %2708 }
 0xc6e   : > { %v2719_v39 = vsub.f32 %v2703_v45, %v2709_v61 }
 0xc70   : > { %v2723_v1 = vmul.f32 1.442695, %v2719_v39 }
 0xc71   : > { %v2715_v62 = vpop.xlane.xlu0 %2714  ;;  %v2712_v63 = vpop.xlane.xlu1 %2711 }
 0xc72   : > { %v2721_v40 = vsub.f32 %v2705_v52, %v2715_v62  ;;  %v2720_v2 = vsub.f32 %v2704_v57, %v2712_v63 }
 0xc74   : > { %v2727_v7 = vmul.f32 1.442695, %v2721_v40  ;;  %v2725_v9 = vmul.f32 1.442695, %v2720_v2 }
 0xc75   : > { %v2718_v19 = vpop.xlane.xlu0 %2717 }
 0xc76   : > { %4558 = vpow2.f32 %v2727_v7  ;;  %v2722_v22 = vsub.f32 %v2706_v58, %v2718_v19 }
 0xc77   : > { %4560 = vpow2.f32 %v2723_v1 }
 0xc78   : > { %v2729_v16 = vmul.f32 1.442695, %v2722_v22 }
 0xc7a   : > { %4562 = vpow2.f32 %v2729_v16 }
 0xc7b   : > { %4564 = vpow2.f32 %v2725_v9 }
 0xc83   : > { %v4559_v17 = vpop.eup %4558 }
 0xc84   : > { %v2737_v18 = vsel %vm1956_vm12, %v4559_v17, 0.0  ;;  %v4561_v20 = vpop.eup %4560 }
 0xc85   : > { %2738 = vadd.xlane.f32.xlu0 %v2737_v18  ;;  %v2731_v24 = vsel %vm1956_vm12, %v4561_v20, 0.0 }
 0xc87   : > { %v4563_v23 = vpop.eup %4562 }
 0xc88   : > { %v2740_v27 = vsel %vm1956_vm12, %v4563_v23, 0.0  ;;  %v4565_v28 = vpop.eup %4564 }
 0xc89   : > { %2732 = vadd.xlane.f32.xlu0 %v2731_v24  ;;  %2741 = vadd.xlane.f32.xlu1 %v2740_v27  ;;  %v2734_v30 = vsel %vm1956_vm12, %v4565_v28, 0.0 }
 0xc8d   : > { %2735 = vadd.xlane.f32.xlu1 %v2734_v30 }
 0xc9e   : > { %2800 = vrot.lane.b32.xlu1 %v5221_v49, %s4803_s16 }
 0xc9f   : > { %2753 = vrot.lane.b32.xlu0 %v5223_v51, %s4803_s16 }
 0xca2   : > { %4451 = vrot.lane.b32.xlu1 %v4450_v48, %s4804_s10 }
 0xca3   : > { %4461 = vrot.lane.b32.xlu0 %v4460_v32, %s4805_s9 }
 0xca6   : > { %4456 = vrot.lane.b32.xlu1 %v4455_v44, %s4804_s10 }
 0xcaa   : > { %4466 = vrot.lane.b32.xlu1 %v4465_v26, %s4805_s9 }
 0xd0e   : > { %v2739_v33 = vpop.xlane.xlu0 %2738 }
 0xd0f   : > { %4566 = vrcp.f32 %v2739_v33 }
 0xd12   : > { %v2733_v49 = vpop.xlane.xlu0 %2732  ;;  %v2742_v34 = vpop.xlane.xlu1 %2741 }
 0xd13   : > { %4568 = vrcp.f32 %v2742_v34 }
 0xd14   : > { %4570 = vrcp.f32 %v2733_v49 }
 0xd16   : > { %v2754_v51 = vpop.permute.xlu0 %2753  ;;  %v2736_v35 = vpop.xlane.xlu1 %2735 }
 0xd17   : > { %4572 = vrcp.f32 %v2736_v35  ;;  %4250 = vmatpush3.bf16.msra.mxu1 %v2754_v51  ;;  %v3995_v35 = vld [vmem:[%s1278_s7] ss:$0 sm:$0xff] }
 0xd18   : > { %4261 = vmatprep.subr.bf16.mxu1 %v4498_v10 }
 0xd1a   : > { %v2801_v42 = vpop.permute.xlu1 %2800  ;;  %v4462_v61 = vpop.permute.xlu0 %4461 }
 0xd1b   : > { %4256 = vmatpush3.bf16.msra.mxu0 %v2801_v42  ;;  %v4464_v9 = vunpack.i.h.bf16 %v4462_v61  ;;  %v4463_v16 = vunpack.i.l.bf16 %v4462_v61 }
 0xd1c   : > { %v4567_v38 = vpop.eup %4566 }
 0xd1d   : > { %v2749_v47 = vmul.f32 %v4567_v38, %v4559_v17 }
 0xd1e   : > { %v4452_v57 = vpop.permute.xlu1 %4451 }
 0xd1f   : > { %v4454_v29 = vunpack.i.h.bf16 %v4452_v57  ;;  %v4453_v60 = vunpack.i.l.bf16 %v4452_v57 }
 0xd20   : > { %v4569_v43 = vpop.eup %4568 }
 0xd21   : > { %v4571_v44 = vpop.eup %4570  ;;  %v2750_v48 = vmul.f32 %v4569_v43, %v4563_v23  ;;  %v2896_v19 = vsel %vm1853_vm11, %v5271_v8, %v4454_v29  ;;  %v2895_v22 = vsel %vm1853_vm11, %v5267_v4, %v4453_v60 }
 0xd22   : > { %v2747_v26 = vmul.f32 %v4571_v44, %v4561_v20  ;;  %v4457_v58 = vpop.permute.xlu1 %4456  ;;  %v2899_v30 = vsel %vm1956_vm12, %v2895_v22, %v4463_v16  ;;  %v2900_v33 = vsel %vm1956_vm12, %v2896_v19, %v4464_v9  ;;  %v4487_v16 = vpack.i.bf16 %v5098_v14, %v5095_v13  ;;  %v4505_v13 = vld [vmem:[%s5130_s14 + $0x20] sm:$0xff]  }
 0xd23   : > { %v2752_v25 = vpack.c.bf16 %v2750_v48, %v2749_v47  ;;  %v4459_v39 = vunpack.i.h.bf16 %v4457_v58  ;;  %v4458_v62 = vunpack.i.l.bf16 %v4457_v58  ;;  %v4590_v47 = vld [vmem:[#allocation2] sm:$0xff] }
 0xd24   : > { %v4573_v21 = vpop.eup %4572 }
 0xd25   : > { %v2748_v32 = vmul.f32 %v4573_v21, %v4565_v28  ;;  %4258 = vmatmul.mubr.msk.bf16.vlgmr.msra.gmra.mxu0 %vm1956_vm12, %v2752_v25  ;;  %v2898_v17 = vsel %vm1853_vm11, %v5269_v6, %v4459_v39  ;;  %v2897_v18 = vsel %vm1853_vm11, %v5265_v0, %v4458_v62 }
 0xd26   : > { %v4467_v59 = vpop.permute.xlu1 %4466 }
 0xd27   : > { %v2751_v36 = vpack.c.bf16 %v2748_v32, %v2747_v26  ;;  %v4469_v63 = vunpack.i.h.bf16 %v4467_v59  ;;  %v4468_v40 = vunpack.i.l.bf16 %v4467_v59 }
 0xd29   : > { %4252 = vmatmul.mubr.msk.bf16.vlgmr.msra.gmra.mxu1 %vm1956_vm12, %v2751_v36  ;;  %v2901_v23 = vsel %vm1956_vm12, %v2897_v18, %v4468_v40  ;;  %v2902_v24 = vsel %vm1956_vm12, %v2898_v17, %v4469_v63  ;;  %v4591_v36 = vld [vmem:[#allocation2 + $0x10] sm:$0xff]  ;;  %v4481_v17 = vpack.i.bf16 %v5092_v12, %v5089_v11  ;;  %v4500_v18 = vld [vmem:[%s5125_s21 + $0x8] sm:$0xff]   ;;  %v4506_v11 = vld [vmem:[%s5130_s14 + $0x18] sm:$0xff]  }
 0xd2a   : > { %4262 = vmatpush3.bf16.msra.mxu1 %v4498_v10  ;;  %4269 = vmatprep.subr.bf16.mxu0 %v4500_v18 }
 0xd2b   : > { %4263 = vmatprep.subr.bf16.mxu1 %v4499_v31  ;;  %4270 = vmatpush3.bf16.msra.mxu0 %v4500_v18 }
 0xd2e   : > { %4264 = vmatpush3.bf16.msra.mxu1 %v4499_v31  ;;  %v4592_v31 = vld [vmem:[#allocation2 + $0x8] sm:$0xff] }
 0xde5   : > { %v2840_v37 = vpop.f32.mrf.mxu0 }
 0xde7   : > { %v4259_v41 = vpop.f32.mrf.mxu0 }
 0xde9   : > { %v2793_v45 = vpop.f32.mrf.mxu1  ;;  %v2843_v46 = vpop.f32.mrf.mxu0 }
 0xdea   : > { %v4475_v50 = vpack.i.bf16 %v2843_v46, %v2840_v37  ;;  %v4593_v46 = vld [vmem:[#allocation2 + $0x18] sm:$0xff] }
 0xdeb   : > { %v4253_v52 = vpop.f32.mrf.mxu1  ;;  %v4260_v53 = vpop.f32.mrf.mxu0 }
 0xdec   : > { %4476 = vrot.lane.b32.xlu1 %v4475_v50, %s4806_s18 }
 0xded   : > { %v2796_v54 = vpop.f32.mrf.mxu1 }
 0xdee   : > { %v4470_v55 = vpack.i.bf16 %v2796_v54, %v2793_v45 }
 0xdef   : > { %v4254_v56 = vpop.f32.mrf.mxu1 }
 0xdf0   : > { %4471 = vrot.lane.b32.xlu0 %v4470_v55, %s4806_s18 }
 0xe5e   : > { %v4477_v1 = vpop.permute.xlu1 %4476 }
 0xe5f   : > { %v4479_v7 = vunpack.i.h.bf16 %v4477_v1  ;;  %v4478_v2 = vunpack.i.l.bf16 %v4477_v1 }
 0xe61   : > { %v2906_v28 = vsel %vm2903_vm13, %v2901_v23, %v4478_v2  ;;  %v2907_v4 = vsel %vm2903_vm13, %v2902_v24, %v4479_v7  ;;  %v4502_v23 = vld [vmem:[%s5130_s14 + $0x38] sm:$0xff]   ;;  %v4503_v24 = vld [vmem:[%s5130_s14 + $0x30] sm:$0xff]  }
 0xe62   : > { %v4472_v20 = vpop.permute.xlu0 %4471  ;;  %v2909_v51 = vpack.c.bf16 %v2907_v4, %v2906_v28  ;;  %4277 = vmatprep.subr.bf16.mxu1 %v4502_v23 }
 0xe63   : > { %v4474_v8 = vunpack.i.h.bf16 %v4472_v20  ;;  %v4473_v27 = vunpack.i.l.bf16 %v4472_v20  ;;  %v4501_v20 = vld [vmem:[%s5125_s21] sm:$0xff]  }
 0xe64   : > { %4271 = vmatprep.subr.bf16.mxu0 %v4501_v20 }
 0xe65   : > { %v2905_v49 = vsel %vm2903_vm13, %v2900_v33, %v4474_v8  ;;  %v2904_v6 = vsel %vm2903_vm13, %v2899_v30, %v4473_v27  ;;  %4272 = vmatpush3.bf16.msra.mxu0 %v4501_v20  ;;  %v4504_v8 = vld [vmem:[%s5130_s14 + $0x28] sm:$0xff]  }
 0xe66   : > { %v2908_v34 = vpack.c.bf16 %v2905_v49, %v2904_v6 }
 0xe68   : > { %4265 = vmatprep.mubr.msk.bf16.mxu1 %vm1647_vm9, %v2908_v34 }
 0xe69   : > { %4266 = vmatmul.mubr.msk.bf16.vlgmr.msra.gmra.mxu1 %vm1647_vm9, %v2909_v51 }
 0xe6a   : > { %4278 = vmatpush3.bf16.msra.mxu1 %v4502_v23 }
 0xe6b   : > { %4279 = vmatprep.subr.bf16.mxu1 %v4503_v24 }
 0xe6e   : > { %4280 = vmatpush3.bf16.msra.mxu1 %v4503_v24 }
 0xe6f   : > { %4281 = vmatprep.subr.bf16.mxu1 %v4504_v8 }
 0xe72   : > { %4282 = vmatpush3.bf16.msra.mxu1 %v4504_v8 }
 0xe73   : > { %4283 = vmatprep.subr.bf16.mxu1 %v4505_v13 }
 0xe76   : > { %4284 = vmatpush3.bf16.msra.mxu1 %v4505_v13 }
 0xe77   : > { %4285 = vmatprep.subr.bf16.mxu1 %v4506_v11 }
 0xe7a   : > { %4286 = vmatpush3.bf16.msra.mxu1 %v4506_v11 }
 0xf29   : > { %v4267_v0 = vpop.f32.mrf.mxu1 }
 0xf2a   : > { %v2982_v38 = vadd.f32 %v4267_v0, %v3995_v35 }
 0xf2b   : > { %v2973_v42 = vpop.f32.mrf.mxu1 }
 0xf2c   : > { %v2974_v43 = vadd.f32 %v3995_v35, %v2973_v42  ;;  %v2990_v10 = vadd.f32 %v4591_v36, %v2982_v38 }
 0xf2d   : > { %v4268_v44 = vpop.f32.mrf.mxu1 }
 0xf2e   : > { %v2988_v48 = vadd.f32 %v4590_v47, %v2974_v43  ;;  %v2985_v25 = vadd.f32 %v4268_v44, %v3995_v35  ;;  %v3000_v45 = vsel %vm1647_vm9, %v2990_v10, 0.0  ;;  %v4000_v44 = vld [vmem:[%s1281_s4] ss:$0 sm:$0xff] }
 0xf2f   : > { %v2976_v21 = vpop.f32.mrf.mxu1 }
 0xf30   : > { %v2977_v26 = vadd.f32 %v3995_v35, %v2976_v21  ;;  %v2994_v32 = vsel %vm1647_vm9, %v2988_v48, 0.0  ;;  %v2991_v50 = vadd.f32 %v4593_v46, %v2985_v25 }
 0xf31   : > { %2995 = vadd.xlane.f32.xlu0 %v2994_v32 }
 0xf32   : > { %v2989_v37 = vadd.f32 %v4592_v31, %v2977_v26  ;;  %v3003_v52 = vsel %vm1647_vm9, %v2991_v50, 0.0 }
 0xf34   : > { %v2997_v41 = vsel %vm1647_vm9, %v2989_v37, 0.0 }
 0xf35   : > { %2998 = vadd.xlane.f32.xlu1 %v2997_v41  ;;  %3001 = vadd.xlane.f32.xlu0 %v3000_v45 }
 0xf39   : > { %3004 = vadd.xlane.f32.xlu0 %v3003_v52 }
 0xfba   : > { %v2996_v53 = vpop.xlane.xlu0 %2995 }
 0xfbb   : > { %v3007_v54 = vmul.f32 0.03125, %v2996_v53 }
 0xfbd   : > { %v5428_v58 = vsub.f32 %v2988_v48, %v3007_v54 }
 0xfbe   : > { %v2999_v55 = vpop.xlane.xlu1 %2998  ;;  %v3002_v56 = vpop.xlane.xlu0 %3001 }
 0xfbf   : > { %v3009_v57 = vmul.f32 0.03125, %v3002_v56  ;;  %v3008_v59 = vmul.f32 0.03125, %v2999_v55  ;;  %v3015_v1 = vmul.f32 %v5428_v58, %v5428_v58 }
 0xfc1   : > { %v3013_v29 = vsub.f32 %v2990_v10, %v3009_v57  ;;  %v5430_v62 = vsub.f32 %v2989_v37, %v3008_v59  ;;  %v3019_v2 = vsel %vm1647_vm9, %v3015_v1, 0.0  ;;  %v4001_v10 = vld [vmem:[%s1284_s8] ss:$0 sm:$0xff] }
 0xfc2   : > { %v3005_v60 = vpop.xlane.xlu0 %3004 }
 0xfc3   : > { %v3010_v61 = vmul.f32 0.03125, %v3005_v60  ;;  %v3017_v39 = vmul.f32 %v3013_v29, %v3013_v29  ;;  %v3016_v22 = vmul.f32 %v5430_v62, %v5430_v62 }
 0xfc5   : > { %v3014_v63 = vsub.f32 %v2991_v50, %v3010_v61  ;;  %v3025_v40 = vsel %vm1647_vm9, %v3017_v39, 0.0  ;;  %v3022_v9 = vsel %vm1647_vm9, %v3016_v22, 0.0  ;;  %v4507_v39 = vld [vmem:[%s5130_s14 + $0x10] sm:$0xff]  }
 0xfc6   : > { %3026 = vadd.xlane.f32.xlu0 %v3025_v40  ;;  %4287 = vmatprep.subr.bf16.mxu1 %v4507_v39 }
 0xfc7   : > { %v3018_v7 = vmul.f32 %v3014_v63, %v3014_v63  ;;  %4288 = vmatpush3.bf16.msra.mxu1 %v4507_v39 }
 0xfc9   : > { %v3028_v19 = vsel %vm1647_vm9, %v3018_v7, 0.0  ;;  %v4002_v7 = vld [vmem:[%s1292_s15] ss:$0 sm:$0xff] }
 0xfca   : > { %3020 = vadd.xlane.f32.xlu0 %v3019_v2  ;;  %3029 = vadd.xlane.f32.xlu1 %v3028_v19 }
 0xfce   : > { %3023 = vadd.xlane.f32.xlu1 %v3022_v9 }
 0xfdf   : > { %4488 = vperm.xlu1 %4486, %v4487_v16  }
 0xfe0   : > { %4482 = vperm.xlu0 %4480, %v4481_v17  }
0x104f   : > { %v3027_v12 = vpop.xlane.xlu0 %3026 }
0x1050   : > { %v3033_v14 = vmul.f32 0.03125, %v3027_v12  ;;  %v4007_v12 = vld [vmem:[%s1300_s22] ss:$0 sm:$0xff] }
0x1052   : > { %v3037_v27 = vadd.f32 1e-05, %v3033_v14 }
0x1053   : > { %v3030_v28 = vpop.xlane.xlu1 %3029  ;;  %v3021_v4 = vpop.xlane.xlu0 %3020 }
0x1054   : > { %v3034_v30 = vmul.f32 0.03125, %v3030_v28  ;;  %v3031_v33 = vmul.f32 0.03125, %v3021_v4  ;;  %4574 = vrsqrt.f32 %v3037_v27 }
0x1056   : > { %v3038_v49 = vadd.f32 1e-05, %v3034_v30  ;;  %v3035_v6 = vadd.f32 1e-05, %v3031_v33 }
0x1057   : > { %v3024_v34 = vpop.xlane.xlu1 %3023 }
0x1058   : > { %4576 = vrsqrt.f32 %v3038_v49  ;;  %v3032_v51 = vmul.f32 0.03125, %v3024_v34 }
0x1059   : > { %4578 = vrsqrt.f32 %v3035_v6 }
0x105a   : > { %v3036_v0 = vadd.f32 1e-05, %v3032_v51 }
0x105b   : > { %v5455_v36 = vpop.permute.xlu0 %4482  ;;  %v5460_v31 = vpop.permute.xlu1 %4488 }
0x105c   : > { %4580 = vrsqrt.f32 %v3036_v0  ;;  %v4491_v45 = vunpack.i.h.bf16 %v5460_v31  ;;  %v4485_v52 = vunpack.i.h.bf16 %v5455_v36  ;;  %v4484_v53 = vunpack.i.l.bf16 %v5455_v36 }
0x105d   : > { %v4490_v54 = vunpack.i.l.bf16 %v5460_v31 }
0x1061   : > { %v4575_v35 = vpop.eup %4574 }
0x1062   : > { %v3045_v38 = vmul.f32 %v4575_v35, %v3013_v29 }
0x1064   : > { %v3055_v26 = vmul.f32 %v4000_v44, %v3045_v38 }
0x1065   : > { %v4577_v42 = vpop.eup %4576 }
0x1066   : > { %v4579_v43 = vpop.eup %4578  ;;  %v3046_v47 = vmul.f32 %v4577_v42, %v3014_v63  ;;  %v3065_v55 = vadd.f32 %v4001_v10, %v3055_v26  ;;  %v4509_v63 = vld [vmem:[%s5130_s14] sm:$0xff]  }
0x1067   : > { %v3043_v48 = vmul.f32 %v4579_v43, %v5428_v58 }
0x1068   : > { %v3056_v21 = vmul.f32 %v4000_v44, %v3046_v47  ;;  %v3089_v29 = vmul.f32 %v4490_v54, %v3065_v55 }
0x1069   : > { %v4581_v25 = vpop.eup %4580  ;;  %v3053_v32 = vmul.f32 %v4000_v44, %v3043_v48 }
0x106a   : > { %v3044_v37 = vmul.f32 %v4581_v25, %v5430_v62  ;;  %v3066_v41 = vadd.f32 %v4001_v10, %v3056_v21  ;;  %v4508_v62 = vld [vmem:[%s5130_s14 + $0x8] sm:$0xff]  }
0x106b   : > { %v3063_v50 = vadd.f32 %v4001_v10, %v3053_v32  ;;  %4289 = vmatprep.subr.bf16.mxu1 %v4508_v62 }
0x106c   : > { %v3054_v46 = vmul.f32 %v4000_v44, %v3044_v37  ;;  %v3090_v57 = vmul.f32 %v4491_v45, %v3066_v41  ;;  %4290 = vmatpush3.bf16.msra.mxu1 %v4508_v62 }
0x106d   : > { %v3087_v59 = vmul.f32 %v4484_v53, %v3063_v50  ;;  %4291 = vmatprep.subr.bf16.mxu1 %v4509_v63 }
0x106e   : > { %v3064_v56 = vadd.f32 %v4001_v10, %v3054_v46  ;;  %v3092_v61 = vpack.c.bf16 %v3090_v57, %v3089_v29 }
0x1070   : > { %v3088_v58 = vmul.f32 %v4485_v52, %v3064_v56  ;;  %4292 = vmatpush3.bf16.msra.mxu1 %v4509_v63 }
0x1072   : > { %v3091_v60 = vpack.c.bf16 %v3088_v58, %v3087_v59 }
0x1074   : > { %4273 = vmatprep.mubr.msk.bf16.mxu0 %vm1647_vm9, %v3091_v60 }
0x1075   : > { %4274 = vmatmul.mubr.msk.bf16.vlgmr.msra.gmra.mxu0 %vm1647_vm9, %v3092_v61 }
0x1135   : > { %v4275_v40 = vpop.f32.mrf.mxu0 }
0x1136   : > { %v3165_v9 = vadd.f32 %v4275_v40, %v4002_v7 }
0x1137   : > { %v3156_v1 = vpop.f32.mrf.mxu0 }
0x1138   : > { %v3157_v19 = vadd.f32 %v4002_v7, %v3156_v1  ;;  %v3173_v24 = vmax.f32 %v3165_v9, 0.0 }
0x1139   : > { %v4276_v2 = vpop.f32.mrf.mxu0 }
0x113a   : > { %v3168_v22 = vadd.f32 %v4276_v2, %v4002_v7  ;;  %v3171_v20 = vmax.f32 %v3157_v19, 0.0 }
0x113b   : > { %v3159_v16 = vpop.f32.mrf.mxu0 }
0x113c   : > { %v3160_v17 = vadd.f32 %v4002_v7, %v3159_v16  ;;  %v3174_v18 = vmax.f32 %v3168_v22, 0.0 }
0x113e   : > { %v3172_v23 = vmax.f32 %v3160_v17, 0.0  ;;  %v3176_v13 = vpack.c.bf16 %v3174_v18, %v3173_v24  ;;  %v4017_v24 = vld [vmem:[%s1306_s19] ss:$0 sm:$0xff] }
0x1140   : > { %v3175_v8 = vpack.c.bf16 %v3172_v23, %v3171_v20  ;;  %v4016_v20 = vld [vmem:[%s1303_s3] ss:$0 sm:$0xff]  ;;  %s5616_s3 = sld [smem:[#allocation43_spill]] }
0x1142   : > { %4293 = vmatprep.mubr.bf16.mxu1 %v3175_v8 }
0x1143   : > { %4294 = vmatmul.mubr.bf16.vlgmr.msra.gmra.mxu1 %v3176_v13 }
0x1146   : > { %p4018_p5 = scmp.ne.s32.totalorder %s5616_s3, 1 }
0x1147   : > { %s5617_s19 = sld [smem:[#allocation34_spill]] (!%p4018_p5) }
0x1148   : > { %s5618_s15 = sld [smem:[#allocation40_spill]] (!%p4018_p5) }
0x1149   : > { %s5619_s0 = sld [smem:[#allocation39_spill]] (!%p4018_p5) }
0x114a   : > { %s5620_s22 = sld [smem:[#allocation35_spill]] (!%p4018_p5) }
0x114b   : > { %s5621_s11 = sld [smem:[#allocation38_spill]] (!%p4018_p5) }
0x114c   : > { %s5622_s23 = sld [smem:[#allocation36_spill]] (!%p4018_p5) }
0x114d   : > { %s5623_s2 = sld [smem:[#allocation37_spill]] (!%p4018_p5) }
0x114e   : > { %s5624_s5 = sld [smem:[#allocation41_spill]] (!%p4018_p5) }
0x1203   : > { %v4295_v11 = vpop.f32.mrf.mxu1 }
0x1204   : > { %v3291_v27 = vadd.f32 %v4295_v11, %v4007_v12 }
0x1205   : > { %v3282_v14 = vpop.f32.mrf.mxu1 }
0x1206   : > { %v3283_v28 = vadd.f32 %v4007_v12, %v3282_v14  ;;  %v3299_v51 = vadd.f32 %v3291_v27, %v3089_v29 }
0x1207   : > { %v4296_v4 = vpop.f32.mrf.mxu1 }
0x1208   : > { %v3297_v30 = vadd.f32 %v3283_v28, %v3087_v59  ;;  %v3294_v49 = vadd.f32 %v4296_v4, %v4007_v12  ;;  %v3309_v42 = vsel %vm1647_vm9, %v3299_v51, 0.0 }
0x1209   : > { %v3285_v33 = vpop.f32.mrf.mxu1 }
0x120a   : > { %v3286_v6 = vadd.f32 %v4007_v12, %v3285_v33  ;;  %v3303_v34 = vsel %vm1647_vm9, %v3297_v30, 0.0  ;;  %v3300_v38 = vadd.f32 %v3294_v49, %v3090_v57 }
0x120b   : > { %3304 = vadd.xlane.f32.xlu1 %v3303_v34 }
0x120c   : > { %v3298_v0 = vadd.f32 %v3286_v6, %v3088_v58  ;;  %v3312_v43 = vsel %vm1647_vm9, %v3300_v38, 0.0 }
0x120e   : > { %v3306_v35 = vsel %vm1647_vm9, %v3298_v0, 0.0 }
0x120f   : > { %3307 = vadd.xlane.f32.xlu0 %v3306_v35  ;;  %3310 = vadd.xlane.f32.xlu1 %v3309_v42 }
0x1213   : > { %3313 = vadd.xlane.f32.xlu1 %v3312_v43 }
0x1294   : > { %v3305_v44 = vpop.xlane.xlu1 %3304 }
0x1295   : > { %v3315_v47 = vmul.f32 0.03125, %v3305_v44 }
0x1297   : > { %v3319_v26 = vsub.f32 %v3297_v30, %v3315_v47 }
0x1298   : > { %v3308_v48 = vpop.xlane.xlu0 %3307  ;;  %v3311_v21 = vpop.xlane.xlu1 %3310 }
0x1299   : > { %v3317_v25 = vmul.f32 0.03125, %v3311_v21  ;;  %v3316_v32 = vmul.f32 0.03125, %v3308_v48  ;;  %v3323_v56 = vmul.f32 %v3319_v26, %v3319_v26 }
0x129b   : > { %v3321_v10 = vsub.f32 %v3299_v51, %v3317_v25  ;;  %v3320_v46 = vsub.f32 %v3298_v0, %v3316_v32  ;;  %v3327_v58 = vsel %vm1647_vm9, %v3323_v56, 0.0 }
0x129c   : > { %v3314_v37 = vpop.xlane.xlu1 %3313 }
0x129d   : > { %v3325_v41 = vmul.f32 %v3321_v10, %v3321_v10  ;;  %v3318_v50 = vmul.f32 0.03125, %v3314_v37  ;;  %v3324_v59 = vmul.f32 %v3320_v46, %v3320_v46 }
0x129f   : > { %v3333_v55 = vsel %vm1647_vm9, %v3325_v41, 0.0  ;;  %v3322_v57 = vsub.f32 %v3300_v38, %v3318_v50  ;;  %v3330_v29 = vsel %vm1647_vm9, %v3324_v59, 0.0 }
0x12a0   : > { %3334 = vadd.xlane.f32.xlu1 %v3333_v55 }
0x12a1   : > { %v3326_v60 = vmul.f32 %v3322_v57, %v3322_v57 }
0x12a3   : > { %v3336_v61 = vsel %vm1647_vm9, %v3326_v60, 0.0 }
0x12a4   : > { %3328 = vadd.xlane.f32.xlu1 %v3327_v58 }
0x12a8   : > { %3331 = vadd.xlane.f32.xlu1 %v3330_v29 }
0x12ac   : > { %3337 = vadd.xlane.f32.xlu1 %v3336_v61 }
0x1329   : > { %v3335_v39 = vpop.xlane.xlu1 %3334 }
0x132a   : > { %v3341_v62 = vmul.f32 0.03125, %v3335_v39 }
0x132c   : > { %v3345_v63 = vadd.f32 1e-05, %v3341_v62 }
0x132d   : > { %v3329_v40 = vpop.xlane.xlu1 %3328 }
0x132e   : > { %4582 = vrsqrt.f32 %v3345_v63  ;;  %v3339_v1 = vmul.f32 0.03125, %v3329_v40 }
0x1330   : > { %v3343_v7 = vadd.f32 1e-05, %v3339_v1 }
0x1331   : > { %v3332_v2 = vpop.xlane.xlu1 %3331 }
0x1332   : > { %4584 = vrsqrt.f32 %v3343_v7  ;;  %v3340_v19 = vmul.f32 0.03125, %v3332_v2 }
0x1334   : > { %v3344_v22 = vadd.f32 1e-05, %v3340_v19 }
0x1335   : > { %v3338_v9 = vpop.xlane.xlu1 %3337 }
0x1336   : > { %4586 = vrsqrt.f32 %v3344_v22  ;;  %v3342_v16 = vmul.f32 0.03125, %v3338_v9 }
0x1338   : > { %v3346_v17 = vadd.f32 1e-05, %v3342_v16 }
0x133a   : > { %4588 = vrsqrt.f32 %v3346_v17 }
0x133b   : > { %v4583_v18 = vpop.eup %4582 }
0x133c   : > { %v3353_v23 = vmul.f32 %v4583_v18, %v3321_v10 }
0x133e   : > { %v3363_v8 = vmul.f32 %v4016_v20, %v3353_v23 }
0x133f   : > { %v4585_v13 = vpop.eup %4584 }
0x1340   : > { %v3373_v11 = vadd.f32 %v4017_v24, %v3363_v8  ;;  %v3351_v12 = vmul.f32 %v4585_v13, %v3319_v26 }
0x1342   : > { %v3377_v14 = vmul.f32 %v4490_v54, %v3373_v11  ;;  %v3361_v27 = vmul.f32 %v4016_v20, %v3351_v12 }
0x1343   : > { %v4587_v28 = vpop.eup %4586 }
0x1344   : > { %3381 = vst.msk [vmem:[#allocation2 + $0x10] sm:$0xff] %vm1647_vm9, %v3377_v14  ;;  %v3371_v4 = vadd.f32 %v4017_v24, %v3361_v27  ;;  %v3352_v30 = vmul.f32 %v4587_v28, %v3320_v46 }
0x1346   : > { %v3375_v33 = vmul.f32 %v4484_v53, %v3371_v4  ;;  %v3362_v49 = vmul.f32 %v4016_v20, %v3352_v30 }
0x1347   : > { %v4589_v6 = vpop.eup %4588 }
0x1348   : > { %3379 = vst.msk [vmem:[#allocation2] sm:$0xff] %vm1647_vm9, %v3375_v33  ;;  %v3372_v34 = vadd.f32 %v4017_v24, %v3362_v49  ;;  %v3354_v51 = vmul.f32 %v4589_v6, %v3322_v57 }
0x134a   : > { %v3376_v0 = vmul.f32 %v4485_v52, %v3372_v34  ;;  %v3364_v35 = vmul.f32 %v4016_v20, %v3354_v51 }
0x134c   : > { %3380 = vst.msk [vmem:[#allocation2 + $0x8] sm:$0xff] %vm1647_vm9, %v3376_v0  ;;  %v3374_v54 = vadd.f32 %v4017_v24, %v3364_v35  ;;  %3386 = sbr.rel (%p4018_p5) target bundleno = 5586 (0x15d2), region = 180 }
0x134e   : > { %v3378_v42 = vmul.f32 %v4491_v45, %v3374_v54 }
0x1350   : > { %3382 = vst.msk [vmem:[#allocation2 + $0x18] sm:$0xff] %vm1647_vm9, %v3378_v42 }
0x1351   : > { %v3387_v53 = vmul.u32 16, %v5070_v3  ;;  %v4807_v38 = vmov 0.0   ;;  %vm4808_vm14 = vmmov 0   ;;  %v4594_v31 = vld [vmem:[%s5617_s19 + $0x8] sm:$0xff]   ;;  %v4595_v3 = vld [vmem:[%s5617_s19] sm:$0xff]   ;;  %v4596_v43 = vld [vmem:[%s5618_s15 + $0x18] sm:$0xff]  }
0x1352   : > { %4297 = vmatprep.subr.mxu1 %v4807_v38  ;;  %4305 = vmatprep.mubr.msk.f32.mxu1 %vm4808_vm14, %v4807_v38  ;;  %v4597_v44 = vld [vmem:[%s5618_s15 + $0x10] sm:$0xff]   ;;  %v4598_v47 = vld [vmem:[%s5618_s15 + $0x8] sm:$0xff]   ;;  %v4599_v48 = vld [vmem:[%s5618_s15] sm:$0xff]   ;;  %vm3606_vm0 = vcmask 523264   ;;  %vm3656_vm1 = vcmask 1024  }
0x1353   : > { %4298 = vmatpush3.msra.mxu1 %v3378_v42  ;;  %4316 = vmatprep.subr.bf16.mxu0 %v4807_v38  ;;  %vm3388_vm15 = vcmp.eq.s32.totalorder %v5138_v15, %v3387_v53  ;;  %v3539_v21 = vld [vmem:[%s5619_s0] sm:$0x1] }
0x1354   : > { %4299 = vmatprep.subr.mxu1 %v4807_v38  ;;  %4324 = vmatprep.mubr.msk.bf16.mxu0 %vm4808_vm14, %v4807_v38  ;;  %v4019_v36 = vsel %vm3388_vm15, 1.0, %v4807_v38  ;;  %v3540_v25 = vadd.f32 1e-05, %v3539_v21  ;;  %v4021_v32 = vld [vmem:[%s5620_s22] ss:$0 sm:$0xff] }
0x1355   : > { %4300 = vmatpush3.msra.mxu1 %v3377_v14  ;;  %4317 = vmatpush3.bf16.msra.mxu0 %v4596_v43  ;;  %v4025_v37 = vld [vmem:[%s5621_s11] ss:$0 sm:$0xff] }
0x1356   : > { %4301 = vmatprep.subr.mxu1 %v4807_v38  ;;  %4318 = vmatprep.subr.bf16.mxu0 %v4807_v38  ;;  %4600 = vrsqrt.f32 %v3540_v25  ;;  %v4026_v56 = vld [vmem:[%s5622_s23] ss:$0 sm:$0xff] }
0x1357   : > { %4302 = vmatpush3.msra.mxu1 %v3376_v0  ;;  %v4027_v29 = vld [vmem:[%s5623_s2] ss:$0 sm:$0xff] }
0x1358   : > { %4303 = vmatprep.subr.mxu1 %v4807_v38  ;;  %v4028_v63 = vld [vmem:[#allocation3] ss:$0 sm:$0xff] }
0x1359   : > { %4304 = vmatpush3.msra.mxu1 %v3375_v33  ;;  %4319 = vmatpush3.bf16.msra.mxu0 %v4597_v44 }
0x135a   : > { %4306 = vmatmul.mubr.msk.f32.vlgmr.msra.gmra.mxu1 %vm1647_vm9, %v4019_v36  ;;  %4308 = vmatprep.subr.bf16.mxu1 %v4807_v38 }
0x135b   : > { %4309 = vmatpush3.bf16.msra.mxu1 %v4594_v31  ;;  %4312 = vmatprep.mubr.msk.bf16.mxu1 %vm4808_vm14, %v4807_v38 }
0x135c   : > { %4310 = vmatprep.subr.bf16.mxu1 %v4807_v38  ;;  %4320 = vmatprep.subr.bf16.mxu0 %v4807_v38 }
0x135d   : > { %4321 = vmatpush3.bf16.msra.mxu0 %v4598_v47 }
0x135e   : > { %4322 = vmatprep.subr.bf16.mxu0 %v4807_v38 }
0x135f   : > { %4311 = vmatpush3.bf16.msra.mxu1 %v4595_v3 }
0x1361   : > { %4323 = vmatpush3.bf16.msra.mxu0 %v4599_v48 }
0x1363   : > { %v4601_v26 = vpop.eup %4600 }
0x1364   : > { %v3546_v46 = vrot.slane %v4601_v26, %v5074_v5 }
0x141a   : > { %v3460_v15 = vpop.f32.mrf.mxu1 }
0x141b   : > { %v3464_v45 = vpack.c.bf16 %v3460_v15, %v3460_v15 }
0x141c   : > { %v4307_v52 = vpop.f32.mrf.mxu1 }
0x141d   : > { %4313 = vmatmul.mubr.msk.bf16.vlgmr.msra.gmra.mxu1 %vm1647_vm9, %v3464_v45 }
0x14dd   : > { %v3525_v10 = vpop.f32.mrf.mxu1 }
0x14de   : > { %v3526_v41 = vadd.f32 %v4021_v32, %v3525_v10 }
0x14df   : > { %v4314_v50 = vpop.f32.mrf.mxu1 }
0x14e0   : > { %v3538_v55 = vsub.f32 %v3526_v41, %v4025_v37 }
0x14e1   : > { %v3528_v57 = vpop.f32.mrf.mxu1 }
0x14e2   : > { %v3548_v58 = vmul.f32 %v3546_v46, %v3538_v55 }
0x14e3   : > { %v4315_v59 = vpop.f32.mrf.mxu1 }
0x14e4   : > { %v3556_v60 = vmul.f32 %v4026_v56, %v3548_v58 }
0x14e6   : > { %v3564_v61 = vadd.f32 %v4027_v29, %v3556_v60 }
0x14e8   : > { %v3565_v39 = vmax.f32 %v3564_v61, 0.0 }
0x14ea   : > { %v3566_v62 = vpack.c.bf16 %v3565_v39, %v3565_v39 }
0x14ec   : > { %4325 = vmatmul.mubr.msk.bf16.vlgmr.msra.gmra.mxu0 %vm3606_vm0, %v3566_v62 }
0x15ac   : > { %v3644_v40 = vpop.f32.mrf.mxu0 }
0x15ad   : > { %v3645_v1 = vadd.f32 %v4028_v63, %v3644_v40 }
0x15ae   : > { %v4326_v7 = vpop.f32.mrf.mxu0 }
0x15af   : > { %v3650_v2 = vsub.f32 0.0, %v3645_v1 }
0x15b0   : > { %v3647_v5 = vpop.f32.mrf.mxu0 }
0x15b1   : > { %v3651_v19 = vmul.f32 1.442695, %v3650_v2 }
0x15b2   : > { %v4327_v22 = vpop.f32.mrf.mxu0 }
0x15b3   : > { %4602 = vpow2.f32 %v3651_v19 }
0x15c0   : > { %v4603_v9 = vpop.eup %4602 }
0x15c1   : > { %v3653_v16 = vadd.f32 1.0, %v4603_v9 }
0x15c3   : > { %4604 = vrcp.f32 %v3653_v16 }
0x15d0   : > { %v4605_v17 = vpop.eup %4604 }
0x15d1   : > { %3657 = vst.msk [vmem:[%s5624_s5] sm:$0x3] %vm3656_vm1, %v4605_v17 }
0x15d2 PF: > { %s5625_s17 = sld [smem:[#allocation42_spill]] }
0x15d8   : > { %s82_s7 = sadd.s32 1, %s5625_s17  }
0x15d9   : > { %p79_p9 = scmp.ge.s32.totalorder %s82_s7, 4  }
0x15db   :  { %81 = sbr.rel (!%p79_p9) target bundleno = 78 (0x4e), region = 285 }
0x15e0   :  { %3669 = vsyncpa [#allocation5], 1 }
0x15e1   :  { %3671 = vsyncpa [#allocation5 + $0x1], 1 }
0x15e2   :  { %3672 = vsyncpa [#allocation7], 1 }
0x15e3   :  { %3673 = vsyncpa [#allocation10], 1 }

</bundles_post_ra>
